<compile_context>
chip_gen: v7x
topology: tpu7x:2x2x1
jax: 0.10.0
libtpu: 0.0.40
codegen_flags: <defaults>
</compile_context>

<pallas_src>
import jax
import jax.numpy as jnp
from jax.experimental import pallas as pl
from jax.experimental.pallas import tpu as pltpu


# ----------------------------------------------------------------------------
# Fused kernel: embedding gather + bi-LSTM stack + avg-pool residual +
#               Conv1d/ReLU/max-pool + FC + sigmoid.
# ----------------------------------------------------------------------------
def make_fused_kernel(n_layers, kernel_sizes, T, B, H):
    nk = len(kernel_sizes)

    def kernel(*refs):
        # ---- unpack refs (scalar prefetch, inputs..., output) --------------
        idx = 0
        text_ref = refs[idx]; idx += 1            # SMEM (B, T) int32 token ids
        embed_ref = refs[idx]; idx += 1           # VMEM (V, 1, E) table
        lstm = []
        for _ in range(n_layers):
            lstm.append(refs[idx:idx + 6]); idx += 6   # Wxf, Whf, bf, Wxb, Whb, bb
        conv_refs = refs[idx:idx + 2 * nk]; idx += 2 * nk   # (w:(k,C,F), b:(1,F))
        fcw_ref, fcb_ref = refs[idx], refs[idx + 1]; idx += 2
        out_ref = refs[idx]

        # ---- fused embedding gather -> time-major flat slab (T*B, E) -------
        rows = []
        for t in range(T):
            for b in range(B):
                rows.append(embed_ref[text_ref[b, t]])       # dynamic tile pick, (1, E)
        x_slab = jnp.concatenate(rows, axis=0)               # (T*B, E), row = t*B + b

        def lstm_cell(gx_t, h, c, Wh):
            # gx_t already holds x_t @ W_x^T + (b_ih + b_hh).
            gates = gx_t + jnp.dot(h, Wh, preferred_element_type=jnp.float32)  # (B, 4H)
            sig = jax.nn.sigmoid(gates)          # full-width: i, f, o in one EUP pass
            th = jnp.tanh(gates)                 # full-width: g in one EUP pass
            i = sig[:, 0 * H:1 * H]
            f = sig[:, 1 * H:2 * H]
            g = th[:, 2 * H:3 * H]
            o = sig[:, 3 * H:4 * H]
            c_new = f * c + i * g
            h_new = o * jnp.tanh(c_new)
            return h_new, c_new

        zeros = jnp.zeros((B, H), jnp.float32)
        hf_list = hb_list = None

        # ---- bidirectional LSTM stack ---------------------------------------
        for l in range(n_layers):
            Wxf, Whf, bf, Wxb, Whb, bb = [r[...] for r in lstm[l]]
            # Hoisted, time-batched input projections: one MXU matmul per dir.
            gxf = jnp.dot(x_slab, Wxf, preferred_element_type=jnp.float32) + bf  # (T*B,4H)
            gxb = jnp.dot(x_slab, Wxb, preferred_element_type=jnp.float32) + bb

            hf = cf = hb = cb = zeros
            hf_list = [None] * T
            hb_list = [None] * T
            # T is small & static -> fully unrolled; states live in vregs.
            for t in range(T):
                s = T - 1 - t
                hf, cf = lstm_cell(gxf[t * B:(t + 1) * B, :], hf, cf, Whf)
                hb, cb = lstm_cell(gxb[s * B:(s + 1) * B, :], hb, cb, Whb)
                hf_list[t] = hf
                hb_list[s] = hb

            if l + 1 < n_layers:   # next layer input = [fwd; bwd] per time step
                x_slab = jnp.concatenate(
                    [jnp.concatenate(hf_list, axis=0),
                     jnp.concatenate(hb_list, axis=0)], axis=1)      # (T*B, 2H)

        # ---- head ------------------------------------------------------------
        # F.avg_pool1d over the full length == mean over time (residual branch),
        # computed directly from the SSA hidden states.
        sf, sb = hf_list[0], hb_list[0]
        for t in range(1, T):
            sf = sf + hf_list[t]
            sb = sb + hb_list[t]
        res = jnp.concatenate([sf, sb], axis=1) * (1.0 / T)          # (B, 2H)

        # Flat time-major sequence slab for the convolutions.
        seq_slab = jnp.concatenate(
            [jnp.concatenate(hf_list, axis=0),
             jnp.concatenate(hb_list, axis=0)], axis=1)              # (T*B, 2H)

        pooled = []
        for ci, k in enumerate(kernel_sizes):
            w_ref = conv_refs[2 * ci]                                # (k, C, F)
            bcv = conv_refs[2 * ci + 1][...]                         # (1, F)
            L = T - k + 1
            acc = None
            for j in range(k):                   # static tap loop -> 2-D MXU matmuls
                xs = seq_slab[j * B:(j + L) * B, :]                  # (L*B, C)
                d = jnp.dot(xs, w_ref[j], preferred_element_type=jnp.float32)
                acc = d if acc is None else acc + d
            acc = jnp.maximum(acc + bcv, 0.0)                        # bias + ReLU
            m = acc[0:B, :]                                          # max_pool1d over L
            for p in range(1, L):
                m = jnp.maximum(m, acc[p * B:(p + 1) * B, :])
            pooled.append(m)
        cat = jnp.concatenate(pooled, axis=1)                        # (B, nk*F)

        combined = res + cat                     # residual add (needs 2H == nk*F)
        logits = jnp.dot(combined, fcw_ref[...],
                         preferred_element_type=jnp.float32) + fcb_ref[...]
        out_ref[...] = jax.nn.sigmoid(logits)

    return kernel


# ----------------------------------------------------------------------------
# Parameters (deterministic, synthetic)
# ----------------------------------------------------------------------------
def init_model_params(key, vocab_size, embedding_dim, hidden_dim, n_layers,
                      kernel_sizes, num_filters, output_dim):
    keys = iter(jax.random.split(key, 128))

    def nrm(shape, scale=0.1):
        return scale * jax.random.normal(next(keys), shape, jnp.float32)

    params = {}
    # Stored (V, 1, E): the kernel gathers rows with a dynamic leading-axis
    # index (each token id picks one VMEM tile).
    params["embed"] = nrm((vocab_size, 1, embedding_dim), 0.5)

    lstm_layers = []
    in_dim = embedding_dim
    for _ in range(n_layers):
        layer = {}
        for d in ("fwd", "bwd"):
            w_ih = nrm((4 * hidden_dim, in_dim))      # PyTorch (4H, E_in)
            w_hh = nrm((4 * hidden_dim, hidden_dim))  # PyTorch (4H, H)
            b_ih = nrm((4 * hidden_dim,))
            b_hh = nrm((4 * hidden_dim,))
            # Keep input / recurrent weights separate so the input projection
            # can be hoisted out of the recurrence (time-batched matmul).
            layer[d] = (w_ih.T, w_hh.T, (b_ih + b_hh)[None, :])   # (E_in,4H),(H,4H),(1,4H)
        lstm_layers.append(layer)
        in_dim = 2 * hidden_dim
    params["lstm"] = lstm_layers

    convs = []
    for k in kernel_sizes:
        w = nrm((num_filters, 2 * hidden_dim, k))     # PyTorch Conv1d (F, C, k)
        b = nrm((num_filters,))
        convs.append((jnp.transpose(w, (2, 1, 0)), b[None, :]))  # -> (k, C, F)
    params["conv"] = convs

    fcw = nrm((output_dim, len(kernel_sizes) * num_filters))     # PyTorch (O, in)
    fcb = nrm((output_dim,))
    params["fc"] = (fcw.T, fcb[None, :])
    return params


# ----------------------------------------------------------------------------
# Full forward pass: ONE fused pallas_call (token ids via scalar prefetch).
# ----------------------------------------------------------------------------
def forward(params, text, kernel_sizes):
    kernel_sizes = tuple(kernel_sizes)
    B, T = text.shape
    n_layers = len(params["lstm"])
    H = params["lstm"][0]["fwd"][1].shape[0]          # W_hh^T is (H, 4H)
    num_filters = params["conv"][0][0].shape[-1]
    assert 2 * H == len(kernel_sizes) * num_filters, \
        "residual add requires 2*hidden_dim == len(kernel_sizes)*num_filters"
    assert max(kernel_sizes) <= T

    fcw, fcb = params["fc"]
    O = fcw.shape[1]

    tensor_ins = [params["embed"]]
    for layer in params["lstm"]:
        tensor_ins += list(layer["fwd"]) + list(layer["bwd"])
    for (w, b) in params["conv"]:
        tensor_ins += [w, b]
    tensor_ins += [fcw, fcb]

    def full_spec(shape):
        n = len(shape)
        # index_map receives (grid idx, scalar-prefetch ref); always block 0.
        return pl.BlockSpec(shape, lambda *_, _n=n: (0,) * _n)

    grid_spec = pltpu.PrefetchScalarGridSpec(
        num_scalar_prefetch=1,                        # token ids land in SMEM
        grid=(1,),
        in_specs=[full_spec(a.shape) for a in tensor_ins],
        out_specs=full_spec((B, O)),
    )

    out = pl.pallas_call(
        make_fused_kernel(n_layers, kernel_sizes, T, B, H),
        out_shape=jax.ShapeDtypeStruct((B, O), jnp.float32),
        grid_spec=grid_spec,
        compiler_params=pltpu.CompilerParams(
            # Single grid step at this batch size; for production batches add
            # a leading batch-tile axis marked "parallel" (v7x: 2 TensorCores).
            dimension_semantics=("arbitrary",),
            vmem_limit_bytes=32 * 1024 * 1024,        # explicit; usage << 1 MiB here
        ),
    )(text.astype(jnp.int32), *tensor_ins)

    return jnp.squeeze(out)    # torch .squeeze()


if __name__ == "__main__":
    key = jax.random.PRNGKey(0)
    B, T = 2, 8
    vocab_size, embedding_dim, hidden_dim = 50, 16, 32
    n_layers = 1
    bidirectional = True
    kernel_sizes = (3, 4)
    num_filters = 32          # len(kernel_sizes) * num_filters == 2 * hidden_dim (residual add)
    output_dim = 1
    pad_idx = 0
    # TODO(synk): dropout is treated as identity (inference mode); no stochastic masking.

    k_params, k_text = jax.random.split(key)
    params = init_model_params(k_params, vocab_size, embedding_dim, hidden_dim,
                               n_layers, kernel_sizes, num_filters, output_dim)
    text = jax.random.randint(k_text, (B, T), 0, vocab_size, dtype=jnp.int32)

    fwd = jax.jit(lambda p, t: forward(p, t, kernel_sizes))
    out = fwd(params, text)
    out = jax.block_until_ready(out)
    assert out.shape == (B,), out.shape
    assert bool(jnp.all(jnp.isfinite(out)))
    print("KERNEL_OK")
</pallas_src>

<mosaic_0001>
module attributes {stable_mosaic.version = 11 : i64} {
  func.func @kernel(%arg0: i32, %arg1: memref<2x8xi32, #tpu.memory_space<smem>>, %arg2: memref<50x1x16xf32, #tpu.memory_space<vmem>>, %arg3: memref<16x128xf32, #tpu.memory_space<vmem>>, %arg4: memref<32x128xf32, #tpu.memory_space<vmem>>, %arg5: memref<1x128xf32, #tpu.memory_space<vmem>>, %arg6: memref<16x128xf32, #tpu.memory_space<vmem>>, %arg7: memref<32x128xf32, #tpu.memory_space<vmem>>, %arg8: memref<1x128xf32, #tpu.memory_space<vmem>>, %arg9: memref<3x64x32xf32, #tpu.memory_space<vmem>>, %arg10: memref<1x32xf32, #tpu.memory_space<vmem>>, %arg11: memref<4x64x32xf32, #tpu.memory_space<vmem>>, %arg12: memref<1x32xf32, #tpu.memory_space<vmem>>, %arg13: memref<64x1xf32, #tpu.memory_space<vmem>>, %arg14: memref<1x1xf32, #tpu.memory_space<vmem>>, %arg15: memref<2x1xf32, #tpu.memory_space<vmem>>) attributes {dimension_semantics = [#tpu.dimension_semantics<arbitrary>], iteration_bounds = array<i64: 1>, scalar_prefetch = 1 : i64, scratch_operands = 0 : i64, tpu.core_type = #tpu.core_type<tc>, window_params = [{pipeline_mode = #tpu.pipeline_mode<synchronous>, transform_indices = @transform_0, window_bounds = array<i64: 50, 1, 16>}, {pipeline_mode = #tpu.pipeline_mode<synchronous>, transform_indices = @transform_1, window_bounds = array<i64: 16, 128>}, {pipeline_mode = #tpu.pipeline_mode<synchronous>, transform_indices = @transform_2, window_bounds = array<i64: 32, 128>}, {pipeline_mode = #tpu.pipeline_mode<synchronous>, transform_indices = @transform_3, window_bounds = array<i64: 1, 128>}, {pipeline_mode = #tpu.pipeline_mode<synchronous>, transform_indices = @transform_4, window_bounds = array<i64: 16, 128>}, {pipeline_mode = #tpu.pipeline_mode<synchronous>, transform_indices = @transform_5, window_bounds = array<i64: 32, 128>}, {pipeline_mode = #tpu.pipeline_mode<synchronous>, transform_indices = @transform_6, window_bounds = array<i64: 1, 128>}, {pipeline_mode = #tpu.pipeline_mode<synchronous>, transform_indices = @transform_7, window_bounds = array<i64: 3, 64, 32>}, {pipeline_mode = #tpu.pipeline_mode<synchronous>, transform_indices = @transform_8, window_bounds = array<i64: 1, 32>}, {pipeline_mode = #tpu.pipeline_mode<synchronous>, transform_indices = @transform_9, window_bounds = array<i64: 4, 64, 32>}, {pipeline_mode = #tpu.pipeline_mode<synchronous>, transform_indices = @transform_10, window_bounds = array<i64: 1, 32>}, {pipeline_mode = #tpu.pipeline_mode<synchronous>, transform_indices = @transform_11, window_bounds = array<i64: 64, 1>}, {pipeline_mode = #tpu.pipeline_mode<synchronous>, transform_indices = @transform_12, window_bounds = array<i64: 1, 1>}, {pipeline_mode = #tpu.pipeline_mode<synchronous>, transform_indices = @transform_13, window_bounds = array<i64: 2, 1>}]} {
    %c0 = arith.constant 0 : index
    %c0_0 = arith.constant 0 : index
    %0 = memref.load %arg1[%c0, %c0_0] : memref<2x8xi32, #tpu.memory_space<smem>>
    %1 = arith.index_cast %0 : i32 to index
    %c0_1 = arith.constant 0 : index
    %c0_2 = arith.constant 0 : index
    %2 = vector.load %arg2[%1, %c0_1, %c0_2] : memref<50x1x16xf32, #tpu.memory_space<vmem>>, vector<1x1x16xf32>
    %3 = vector.shape_cast %2 : vector<1x1x16xf32> to vector<1x16xf32>
    %c1 = arith.constant 1 : index
    %c0_3 = arith.constant 0 : index
    %4 = memref.load %arg1[%c1, %c0_3] : memref<2x8xi32, #tpu.memory_space<smem>>
    %5 = arith.index_cast %4 : i32 to index
    %c0_4 = arith.constant 0 : index
    %c0_5 = arith.constant 0 : index
    %6 = vector.load %arg2[%5, %c0_4, %c0_5] : memref<50x1x16xf32, #tpu.memory_space<vmem>>, vector<1x1x16xf32>
    %7 = vector.shape_cast %6 : vector<1x1x16xf32> to vector<1x16xf32>
    %c0_6 = arith.constant 0 : index
    %c1_7 = arith.constant 1 : index
    %8 = memref.load %arg1[%c0_6, %c1_7] : memref<2x8xi32, #tpu.memory_space<smem>>
    %9 = arith.index_cast %8 : i32 to index
    %c0_8 = arith.constant 0 : index
    %c0_9 = arith.constant 0 : index
    %10 = vector.load %arg2[%9, %c0_8, %c0_9] : memref<50x1x16xf32, #tpu.memory_space<vmem>>, vector<1x1x16xf32>
    %11 = vector.shape_cast %10 : vector<1x1x16xf32> to vector<1x16xf32>
    %c1_10 = arith.constant 1 : index
    %c1_11 = arith.constant 1 : index
    %12 = memref.load %arg1[%c1_10, %c1_11] : memref<2x8xi32, #tpu.memory_space<smem>>
    %13 = arith.index_cast %12 : i32 to index
    %c0_12 = arith.constant 0 : index
    %c0_13 = arith.constant 0 : index
    %14 = vector.load %arg2[%13, %c0_12, %c0_13] : memref<50x1x16xf32, #tpu.memory_space<vmem>>, vector<1x1x16xf32>
    %15 = vector.shape_cast %14 : vector<1x1x16xf32> to vector<1x16xf32>
    %c0_14 = arith.constant 0 : index
    %c2 = arith.constant 2 : index
    %16 = memref.load %arg1[%c0_14, %c2] : memref<2x8xi32, #tpu.memory_space<smem>>
    %17 = arith.index_cast %16 : i32 to index
    %c0_15 = arith.constant 0 : index
    %c0_16 = arith.constant 0 : index
    %18 = vector.load %arg2[%17, %c0_15, %c0_16] : memref<50x1x16xf32, #tpu.memory_space<vmem>>, vector<1x1x16xf32>
    %19 = vector.shape_cast %18 : vector<1x1x16xf32> to vector<1x16xf32>
    %c1_17 = arith.constant 1 : index
    %c2_18 = arith.constant 2 : index
    %20 = memref.load %arg1[%c1_17, %c2_18] : memref<2x8xi32, #tpu.memory_space<smem>>
    %21 = arith.index_cast %20 : i32 to index
    %c0_19 = arith.constant 0 : index
    %c0_20 = arith.constant 0 : index
    %22 = vector.load %arg2[%21, %c0_19, %c0_20] : memref<50x1x16xf32, #tpu.memory_space<vmem>>, vector<1x1x16xf32>
    %23 = vector.shape_cast %22 : vector<1x1x16xf32> to vector<1x16xf32>
    %c0_21 = arith.constant 0 : index
    %c3 = arith.constant 3 : index
    %24 = memref.load %arg1[%c0_21, %c3] : memref<2x8xi32, #tpu.memory_space<smem>>
    %25 = arith.index_cast %24 : i32 to index
    %c0_22 = arith.constant 0 : index
    %c0_23 = arith.constant 0 : index
    %26 = vector.load %arg2[%25, %c0_22, %c0_23] : memref<50x1x16xf32, #tpu.memory_space<vmem>>, vector<1x1x16xf32>
    %27 = vector.shape_cast %26 : vector<1x1x16xf32> to vector<1x16xf32>
    %c1_24 = arith.constant 1 : index
    %c3_25 = arith.constant 3 : index
    %28 = memref.load %arg1[%c1_24, %c3_25] : memref<2x8xi32, #tpu.memory_space<smem>>
    %29 = arith.index_cast %28 : i32 to index
    %c0_26 = arith.constant 0 : index
    %c0_27 = arith.constant 0 : index
    %30 = vector.load %arg2[%29, %c0_26, %c0_27] : memref<50x1x16xf32, #tpu.memory_space<vmem>>, vector<1x1x16xf32>
    %31 = vector.shape_cast %30 : vector<1x1x16xf32> to vector<1x16xf32>
    %c0_28 = arith.constant 0 : index
    %c4 = arith.constant 4 : index
    %32 = memref.load %arg1[%c0_28, %c4] : memref<2x8xi32, #tpu.memory_space<smem>>
    %33 = arith.index_cast %32 : i32 to index
    %c0_29 = arith.constant 0 : index
    %c0_30 = arith.constant 0 : index
    %34 = vector.load %arg2[%33, %c0_29, %c0_30] : memref<50x1x16xf32, #tpu.memory_space<vmem>>, vector<1x1x16xf32>
    %35 = vector.shape_cast %34 : vector<1x1x16xf32> to vector<1x16xf32>
    %c1_31 = arith.constant 1 : index
    %c4_32 = arith.constant 4 : index
    %36 = memref.load %arg1[%c1_31, %c4_32] : memref<2x8xi32, #tpu.memory_space<smem>>
    %37 = arith.index_cast %36 : i32 to index
    %c0_33 = arith.constant 0 : index
    %c0_34 = arith.constant 0 : index
    %38 = vector.load %arg2[%37, %c0_33, %c0_34] : memref<50x1x16xf32, #tpu.memory_space<vmem>>, vector<1x1x16xf32>
    %39 = vector.shape_cast %38 : vector<1x1x16xf32> to vector<1x16xf32>
    %c0_35 = arith.constant 0 : index
    %c5 = arith.constant 5 : index
    %40 = memref.load %arg1[%c0_35, %c5] : memref<2x8xi32, #tpu.memory_space<smem>>
    %41 = arith.index_cast %40 : i32 to index
    %c0_36 = arith.constant 0 : index
    %c0_37 = arith.constant 0 : index
    %42 = vector.load %arg2[%41, %c0_36, %c0_37] : memref<50x1x16xf32, #tpu.memory_space<vmem>>, vector<1x1x16xf32>
    %43 = vector.shape_cast %42 : vector<1x1x16xf32> to vector<1x16xf32>
    %c1_38 = arith.constant 1 : index
    %c5_39 = arith.constant 5 : index
    %44 = memref.load %arg1[%c1_38, %c5_39] : memref<2x8xi32, #tpu.memory_space<smem>>
    %45 = arith.index_cast %44 : i32 to index
    %c0_40 = arith.constant 0 : index
    %c0_41 = arith.constant 0 : index
    %46 = vector.load %arg2[%45, %c0_40, %c0_41] : memref<50x1x16xf32, #tpu.memory_space<vmem>>, vector<1x1x16xf32>
    %47 = vector.shape_cast %46 : vector<1x1x16xf32> to vector<1x16xf32>
    %c0_42 = arith.constant 0 : index
    %c6 = arith.constant 6 : index
    %48 = memref.load %arg1[%c0_42, %c6] : memref<2x8xi32, #tpu.memory_space<smem>>
    %49 = arith.index_cast %48 : i32 to index
    %c0_43 = arith.constant 0 : index
    %c0_44 = arith.constant 0 : index
    %50 = vector.load %arg2[%49, %c0_43, %c0_44] : memref<50x1x16xf32, #tpu.memory_space<vmem>>, vector<1x1x16xf32>
    %51 = vector.shape_cast %50 : vector<1x1x16xf32> to vector<1x16xf32>
    %c1_45 = arith.constant 1 : index
    %c6_46 = arith.constant 6 : index
    %52 = memref.load %arg1[%c1_45, %c6_46] : memref<2x8xi32, #tpu.memory_space<smem>>
    %53 = arith.index_cast %52 : i32 to index
    %c0_47 = arith.constant 0 : index
    %c0_48 = arith.constant 0 : index
    %54 = vector.load %arg2[%53, %c0_47, %c0_48] : memref<50x1x16xf32, #tpu.memory_space<vmem>>, vector<1x1x16xf32>
    %55 = vector.shape_cast %54 : vector<1x1x16xf32> to vector<1x16xf32>
    %c0_49 = arith.constant 0 : index
    %c7 = arith.constant 7 : index
    %56 = memref.load %arg1[%c0_49, %c7] : memref<2x8xi32, #tpu.memory_space<smem>>
    %57 = arith.index_cast %56 : i32 to index
    %c0_50 = arith.constant 0 : index
    %c0_51 = arith.constant 0 : index
    %58 = vector.load %arg2[%57, %c0_50, %c0_51] : memref<50x1x16xf32, #tpu.memory_space<vmem>>, vector<1x1x16xf32>
    %59 = vector.shape_cast %58 : vector<1x1x16xf32> to vector<1x16xf32>
    %c1_52 = arith.constant 1 : index
    %c7_53 = arith.constant 7 : index
    %60 = memref.load %arg1[%c1_52, %c7_53] : memref<2x8xi32, #tpu.memory_space<smem>>
    %61 = arith.index_cast %60 : i32 to index
    %c0_54 = arith.constant 0 : index
    %c0_55 = arith.constant 0 : index
    %62 = vector.load %arg2[%61, %c0_54, %c0_55] : memref<50x1x16xf32, #tpu.memory_space<vmem>>, vector<1x1x16xf32>
    %63 = vector.shape_cast %62 : vector<1x1x16xf32> to vector<1x16xf32>
    %64 = tpu.concatenate %3, %7, %11, %15, %19, %23, %27, %31, %35, %39, %43, %47, %51, %55, %59, %63 in 0 : vector<1x16xf32>, vector<1x16xf32>, vector<1x16xf32>, vector<1x16xf32>, vector<1x16xf32>, vector<1x16xf32>, vector<1x16xf32>, vector<1x16xf32>, vector<1x16xf32>, vector<1x16xf32>, vector<1x16xf32>, vector<1x16xf32>, vector<1x16xf32>, vector<1x16xf32>, vector<1x16xf32>, vector<1x16xf32> -> vector<16x16xf32>
    %cst = arith.constant 0.000000e+00 : f32
    %65 = vector.broadcast %cst : f32 to vector<2x32xf32>
    %c0_56 = arith.constant 0 : index
    %c0_57 = arith.constant 0 : index
    %66 = vector.load %arg3[%c0_56, %c0_57] : memref<16x128xf32, #tpu.memory_space<vmem>>, vector<16x128xf32>
    %c0_58 = arith.constant 0 : index
    %c0_59 = arith.constant 0 : index
    %67 = vector.load %arg4[%c0_58, %c0_59] : memref<32x128xf32, #tpu.memory_space<vmem>>, vector<32x128xf32>
    %c0_60 = arith.constant 0 : index
    %c0_61 = arith.constant 0 : index
    %68 = vector.load %arg5[%c0_60, %c0_61] : memref<1x128xf32, #tpu.memory_space<vmem>>, vector<1x128xf32>
    %c0_62 = arith.constant 0 : index
    %c0_63 = arith.constant 0 : index
    %69 = vector.load %arg6[%c0_62, %c0_63] : memref<16x128xf32, #tpu.memory_space<vmem>>, vector<16x128xf32>
    %c0_64 = arith.constant 0 : index
    %c0_65 = arith.constant 0 : index
    %70 = vector.load %arg7[%c0_64, %c0_65] : memref<32x128xf32, #tpu.memory_space<vmem>>, vector<32x128xf32>
    %c0_66 = arith.constant 0 : index
    %c0_67 = arith.constant 0 : index
    %71 = vector.load %arg8[%c0_66, %c0_67] : memref<1x128xf32, #tpu.memory_space<vmem>>, vector<1x128xf32>
    %cst_68 = arith.constant dense<0.000000e+00> : vector<16x128xf32>
    %72 = tpu.matmul %64, %66, %cst_68 {dimension_numbers = #tpu.dot_dimension_numbers<[1], [0], [0], [1], [0, 0, 1, 1], [], []>} : vector<16x16xf32>, vector<16x128xf32>, vector<16x128xf32> -> vector<16x128xf32>
    %73 = vector.broadcast %68 : vector<1x128xf32> to vector<16x128xf32>
    %74 = arith.addf %72, %73 : vector<16x128xf32>
    %cst_69 = arith.constant dense<0.000000e+00> : vector<16x128xf32>
    %75 = tpu.matmul %64, %69, %cst_69 {dimension_numbers = #tpu.dot_dimension_numbers<[1], [0], [0], [1], [0, 0, 1, 1], [], []>} : vector<16x16xf32>, vector<16x128xf32>, vector<16x128xf32> -> vector<16x128xf32>
    %76 = vector.broadcast %71 : vector<1x128xf32> to vector<16x128xf32>
    %77 = arith.addf %75, %76 : vector<16x128xf32>
    %78 = vector.extract_strided_slice %74 {offsets = [0, 0], sizes = [2, 128], strides = [1, 1]} : vector<16x128xf32> to vector<2x128xf32>
    %cst_70 = arith.constant dense<0.000000e+00> : vector<2x128xf32>
    %79 = tpu.matmul %65, %67, %cst_70 {dimension_numbers = #tpu.dot_dimension_numbers<[1], [0], [0], [1], [0, 0, 1, 1], [], []>} : vector<2x32xf32>, vector<32x128xf32>, vector<2x128xf32> -> vector<2x128xf32>
    %80 = arith.addf %78, %79 : vector<2x128xf32>
    %81 = arith.negf %80 : vector<2x128xf32>
    %82 = math.exp %81 : vector<2x128xf32>
    %cst_71 = arith.constant 1.000000e+00 : f32
    %83 = vector.broadcast %cst_71 : f32 to vector<2x128xf32>
    %84 = arith.addf %83, %82 : vector<2x128xf32>
    %85 = arith.divf %83, %84 : vector<2x128xf32>
    %86 = math.tanh %80 : vector<2x128xf32>
    %87 = vector.extract_strided_slice %85 {offsets = [0, 0], sizes = [2, 32], strides = [1, 1]} : vector<2x128xf32> to vector<2x32xf32>
    %88 = vector.extract_strided_slice %85 {offsets = [0, 32], sizes = [2, 32], strides = [1, 1]} : vector<2x128xf32> to vector<2x32xf32>
    %89 = vector.extract_strided_slice %86 {offsets = [0, 64], sizes = [2, 32], strides = [1, 1]} : vector<2x128xf32> to vector<2x32xf32>
    %90 = vector.extract_strided_slice %85 {offsets = [0, 96], sizes = [2, 32], strides = [1, 1]} : vector<2x128xf32> to vector<2x32xf32>
    %91 = arith.mulf %88, %65 : vector<2x32xf32>
    %92 = arith.mulf %87, %89 : vector<2x32xf32>
    %93 = arith.addf %91, %92 : vector<2x32xf32>
    %94 = math.tanh %93 : vector<2x32xf32>
    %95 = arith.mulf %90, %94 : vector<2x32xf32>
    %96 = vector.extract_strided_slice %77 {offsets = [14, 0], sizes = [2, 128], strides = [1, 1]} : vector<16x128xf32> to vector<2x128xf32>
    %cst_72 = arith.constant dense<0.000000e+00> : vector<2x128xf32>
    %97 = tpu.matmul %65, %70, %cst_72 {dimension_numbers = #tpu.dot_dimension_numbers<[1], [0], [0], [1], [0, 0, 1, 1], [], []>} : vector<2x32xf32>, vector<32x128xf32>, vector<2x128xf32> -> vector<2x128xf32>
    %98 = arith.addf %96, %97 : vector<2x128xf32>
    %99 = arith.negf %98 : vector<2x128xf32>
    %100 = math.exp %99 : vector<2x128xf32>
    %cst_73 = arith.constant 1.000000e+00 : f32
    %101 = vector.broadcast %cst_73 : f32 to vector<2x128xf32>
    %102 = arith.addf %101, %100 : vector<2x128xf32>
    %103 = arith.divf %101, %102 : vector<2x128xf32>
    %104 = math.tanh %98 : vector<2x128xf32>
    %105 = vector.extract_strided_slice %103 {offsets = [0, 0], sizes = [2, 32], strides = [1, 1]} : vector<2x128xf32> to vector<2x32xf32>
    %106 = vector.extract_strided_slice %103 {offsets = [0, 32], sizes = [2, 32], strides = [1, 1]} : vector<2x128xf32> to vector<2x32xf32>
    %107 = vector.extract_strided_slice %104 {offsets = [0, 64], sizes = [2, 32], strides = [1, 1]} : vector<2x128xf32> to vector<2x32xf32>
    %108 = vector.extract_strided_slice %103 {offsets = [0, 96], sizes = [2, 32], strides = [1, 1]} : vector<2x128xf32> to vector<2x32xf32>
    %109 = arith.mulf %106, %65 : vector<2x32xf32>
    %110 = arith.mulf %105, %107 : vector<2x32xf32>
    %111 = arith.addf %109, %110 : vector<2x32xf32>
    %112 = math.tanh %111 : vector<2x32xf32>
    %113 = arith.mulf %108, %112 : vector<2x32xf32>
    %114 = vector.extract_strided_slice %74 {offsets = [2, 0], sizes = [2, 128], strides = [1, 1]} : vector<16x128xf32> to vector<2x128xf32>
    %cst_74 = arith.constant dense<0.000000e+00> : vector<2x128xf32>
    %115 = tpu.matmul %95, %67, %cst_74 {dimension_numbers = #tpu.dot_dimension_numbers<[1], [0], [0], [1], [0, 0, 1, 1], [], []>} : vector<2x32xf32>, vector<32x128xf32>, vector<2x128xf32> -> vector<2x128xf32>
    %116 = arith.addf %114, %115 : vector<2x128xf32>
    %117 = arith.negf %116 : vector<2x128xf32>
    %118 = math.exp %117 : vector<2x128xf32>
    %cst_75 = arith.constant 1.000000e+00 : f32
    %119 = vector.broadcast %cst_75 : f32 to vector<2x128xf32>
    %120 = arith.addf %119, %118 : vector<2x128xf32>
    %121 = arith.divf %119, %120 : vector<2x128xf32>
    %122 = math.tanh %116 : vector<2x128xf32>
    %123 = vector.extract_strided_slice %121 {offsets = [0, 0], sizes = [2, 32], strides = [1, 1]} : vector<2x128xf32> to vector<2x32xf32>
    %124 = vector.extract_strided_slice %121 {offsets = [0, 32], sizes = [2, 32], strides = [1, 1]} : vector<2x128xf32> to vector<2x32xf32>
    %125 = vector.extract_strided_slice %122 {offsets = [0, 64], sizes = [2, 32], strides = [1, 1]} : vector<2x128xf32> to vector<2x32xf32>
    %126 = vector.extract_strided_slice %121 {offsets = [0, 96], sizes = [2, 32], strides = [1, 1]} : vector<2x128xf32> to vector<2x32xf32>
    %127 = arith.mulf %124, %93 : vector<2x32xf32>
    %128 = arith.mulf %123, %125 : vector<2x32xf32>
    %129 = arith.addf %127, %128 : vector<2x32xf32>
    %130 = math.tanh %129 : vector<2x32xf32>
    %131 = arith.mulf %126, %130 : vector<2x32xf32>
    %132 = vector.extract_strided_slice %77 {offsets = [12, 0], sizes = [2, 128], strides = [1, 1]} : vector<16x128xf32> to vector<2x128xf32>
    %cst_76 = arith.constant dense<0.000000e+00> : vector<2x128xf32>
    %133 = tpu.matmul %113, %70, %cst_76 {dimension_numbers = #tpu.dot_dimension_numbers<[1], [0], [0], [1], [0, 0, 1, 1], [], []>} : vector<2x32xf32>, vector<32x128xf32>, vector<2x128xf32> -> vector<2x128xf32>
    %134 = arith.addf %132, %133 : vector<2x128xf32>
    %135 = arith.negf %134 : vector<2x128xf32>
    %136 = math.exp %135 : vector<2x128xf32>
    %cst_77 = arith.constant 1.000000e+00 : f32
    %137 = vector.broadcast %cst_77 : f32 to vector<2x128xf32>
    %138 = arith.addf %137, %136 : vector<2x128xf32>
    %139 = arith.divf %137, %138 : vector<2x128xf32>
    %140 = math.tanh %134 : vector<2x128xf32>
    %141 = vector.extract_strided_slice %139 {offsets = [0, 0], sizes = [2, 32], strides = [1, 1]} : vector<2x128xf32> to vector<2x32xf32>
    %142 = vector.extract_strided_slice %139 {offsets = [0, 32], sizes = [2, 32], strides = [1, 1]} : vector<2x128xf32> to vector<2x32xf32>
    %143 = vector.extract_strided_slice %140 {offsets = [0, 64], sizes = [2, 32], strides = [1, 1]} : vector<2x128xf32> to vector<2x32xf32>
    %144 = vector.extract_strided_slice %139 {offsets = [0, 96], sizes = [2, 32], strides = [1, 1]} : vector<2x128xf32> to vector<2x32xf32>
    %145 = arith.mulf %142, %111 : vector<2x32xf32>
    %146 = arith.mulf %141, %143 : vector<2x32xf32>
    %147 = arith.addf %145, %146 : vector<2x32xf32>
    %148 = math.tanh %147 : vector<2x32xf32>
    %149 = arith.mulf %144, %148 : vector<2x32xf32>
    %150 = vector.extract_strided_slice %74 {offsets = [4, 0], sizes = [2, 128], strides = [1, 1]} : vector<16x128xf32> to vector<2x128xf32>
    %cst_78 = arith.constant dense<0.000000e+00> : vector<2x128xf32>
    %151 = tpu.matmul %131, %67, %cst_78 {dimension_numbers = #tpu.dot_dimension_numbers<[1], [0], [0], [1], [0, 0, 1, 1], [], []>} : vector<2x32xf32>, vector<32x128xf32>, vector<2x128xf32> -> vector<2x128xf32>
    %152 = arith.addf %150, %151 : vector<2x128xf32>
    %153 = arith.negf %152 : vector<2x128xf32>
    %154 = math.exp %153 : vector<2x128xf32>
    %cst_79 = arith.constant 1.000000e+00 : f32
    %155 = vector.broadcast %cst_79 : f32 to vector<2x128xf32>
    %156 = arith.addf %155, %154 : vector<2x128xf32>
    %157 = arith.divf %155, %156 : vector<2x128xf32>
    %158 = math.tanh %152 : vector<2x128xf32>
    %159 = vector.extract_strided_slice %157 {offsets = [0, 0], sizes = [2, 32], strides = [1, 1]} : vector<2x128xf32> to vector<2x32xf32>
    %160 = vector.extract_strided_slice %157 {offsets = [0, 32], sizes = [2, 32], strides = [1, 1]} : vector<2x128xf32> to vector<2x32xf32>
    %161 = vector.extract_strided_slice %158 {offsets = [0, 64], sizes = [2, 32], strides = [1, 1]} : vector<2x128xf32> to vector<2x32xf32>
    %162 = vector.extract_strided_slice %157 {offsets = [0, 96], sizes = [2, 32], strides = [1, 1]} : vector<2x128xf32> to vector<2x32xf32>
    %163 = arith.mulf %160, %129 : vector<2x32xf32>
    %164 = arith.mulf %159, %161 : vector<2x32xf32>
    %165 = arith.addf %163, %164 : vector<2x32xf32>
    %166 = math.tanh %165 : vector<2x32xf32>
    %167 = arith.mulf %162, %166 : vector<2x32xf32>
    %168 = vector.extract_strided_slice %77 {offsets = [10, 0], sizes = [2, 128], strides = [1, 1]} : vector<16x128xf32> to vector<2x128xf32>
    %cst_80 = arith.constant dense<0.000000e+00> : vector<2x128xf32>
    %169 = tpu.matmul %149, %70, %cst_80 {dimension_numbers = #tpu.dot_dimension_numbers<[1], [0], [0], [1], [0, 0, 1, 1], [], []>} : vector<2x32xf32>, vector<32x128xf32>, vector<2x128xf32> -> vector<2x128xf32>
    %170 = arith.addf %168, %169 : vector<2x128xf32>
    %171 = arith.negf %170 : vector<2x128xf32>
    %172 = math.exp %171 : vector<2x128xf32>
    %cst_81 = arith.constant 1.000000e+00 : f32
    %173 = vector.broadcast %cst_81 : f32 to vector<2x128xf32>
    %174 = arith.addf %173, %172 : vector<2x128xf32>
    %175 = arith.divf %173, %174 : vector<2x128xf32>
    %176 = math.tanh %170 : vector<2x128xf32>
    %177 = vector.extract_strided_slice %175 {offsets = [0, 0], sizes = [2, 32], strides = [1, 1]} : vector<2x128xf32> to vector<2x32xf32>
    %178 = vector.extract_strided_slice %175 {offsets = [0, 32], sizes = [2, 32], strides = [1, 1]} : vector<2x128xf32> to vector<2x32xf32>
    %179 = vector.extract_strided_slice %176 {offsets = [0, 64], sizes = [2, 32], strides = [1, 1]} : vector<2x128xf32> to vector<2x32xf32>
    %180 = vector.extract_strided_slice %175 {offsets = [0, 96], sizes = [2, 32], strides = [1, 1]} : vector<2x128xf32> to vector<2x32xf32>
    %181 = arith.mulf %178, %147 : vector<2x32xf32>
    %182 = arith.mulf %177, %179 : vector<2x32xf32>
    %183 = arith.addf %181, %182 : vector<2x32xf32>
    %184 = math.tanh %183 : vector<2x32xf32>
    %185 = arith.mulf %180, %184 : vector<2x32xf32>
    %186 = vector.extract_strided_slice %74 {offsets = [6, 0], sizes = [2, 128], strides = [1, 1]} : vector<16x128xf32> to vector<2x128xf32>
    %cst_82 = arith.constant dense<0.000000e+00> : vector<2x128xf32>
    %187 = tpu.matmul %167, %67, %cst_82 {dimension_numbers = #tpu.dot_dimension_numbers<[1], [0], [0], [1], [0, 0, 1, 1], [], []>} : vector<2x32xf32>, vector<32x128xf32>, vector<2x128xf32> -> vector<2x128xf32>
    %188 = arith.addf %186, %187 : vector<2x128xf32>
    %189 = arith.negf %188 : vector<2x128xf32>
    %190 = math.exp %189 : vector<2x128xf32>
    %cst_83 = arith.constant 1.000000e+00 : f32
    %191 = vector.broadcast %cst_83 : f32 to vector<2x128xf32>
    %192 = arith.addf %191, %190 : vector<2x128xf32>
    %193 = arith.divf %191, %192 : vector<2x128xf32>
    %194 = math.tanh %188 : vector<2x128xf32>
    %195 = vector.extract_strided_slice %193 {offsets = [0, 0], sizes = [2, 32], strides = [1, 1]} : vector<2x128xf32> to vector<2x32xf32>
    %196 = vector.extract_strided_slice %193 {offsets = [0, 32], sizes = [2, 32], strides = [1, 1]} : vector<2x128xf32> to vector<2x32xf32>
    %197 = vector.extract_strided_slice %194 {offsets = [0, 64], sizes = [2, 32], strides = [1, 1]} : vector<2x128xf32> to vector<2x32xf32>
    %198 = vector.extract_strided_slice %193 {offsets = [0, 96], sizes = [2, 32], strides = [1, 1]} : vector<2x128xf32> to vector<2x32xf32>
    %199 = arith.mulf %196, %165 : vector<2x32xf32>
    %200 = arith.mulf %195, %197 : vector<2x32xf32>
    %201 = arith.addf %199, %200 : vector<2x32xf32>
    %202 = math.tanh %201 : vector<2x32xf32>
    %203 = arith.mulf %198, %202 : vector<2x32xf32>
    %204 = vector.extract_strided_slice %77 {offsets = [8, 0], sizes = [2, 128], strides = [1, 1]} : vector<16x128xf32> to vector<2x128xf32>
    %cst_84 = arith.constant dense<0.000000e+00> : vector<2x128xf32>
    %205 = tpu.matmul %185, %70, %cst_84 {dimension_numbers = #tpu.dot_dimension_numbers<[1], [0], [0], [1], [0, 0, 1, 1], [], []>} : vector<2x32xf32>, vector<32x128xf32>, vector<2x128xf32> -> vector<2x128xf32>
    %206 = arith.addf %204, %205 : vector<2x128xf32>
    %207 = arith.negf %206 : vector<2x128xf32>
    %208 = math.exp %207 : vector<2x128xf32>
    %cst_85 = arith.constant 1.000000e+00 : f32
    %209 = vector.broadcast %cst_85 : f32 to vector<2x128xf32>
    %210 = arith.addf %209, %208 : vector<2x128xf32>
    %211 = arith.divf %209, %210 : vector<2x128xf32>
    %212 = math.tanh %206 : vector<2x128xf32>
    %213 = vector.extract_strided_slice %211 {offsets = [0, 0], sizes = [2, 32], strides = [1, 1]} : vector<2x128xf32> to vector<2x32xf32>
    %214 = vector.extract_strided_slice %211 {offsets = [0, 32], sizes = [2, 32], strides = [1, 1]} : vector<2x128xf32> to vector<2x32xf32>
    %215 = vector.extract_strided_slice %212 {offsets = [0, 64], sizes = [2, 32], strides = [1, 1]} : vector<2x128xf32> to vector<2x32xf32>
    %216 = vector.extract_strided_slice %211 {offsets = [0, 96], sizes = [2, 32], strides = [1, 1]} : vector<2x128xf32> to vector<2x32xf32>
    %217 = arith.mulf %214, %183 : vector<2x32xf32>
    %218 = arith.mulf %213, %215 : vector<2x32xf32>
    %219 = arith.addf %217, %218 : vector<2x32xf32>
    %220 = math.tanh %219 : vector<2x32xf32>
    %221 = arith.mulf %216, %220 : vector<2x32xf32>
    %222 = vector.extract_strided_slice %74 {offsets = [8, 0], sizes = [2, 128], strides = [1, 1]} : vector<16x128xf32> to vector<2x128xf32>
    %cst_86 = arith.constant dense<0.000000e+00> : vector<2x128xf32>
    %223 = tpu.matmul %203, %67, %cst_86 {dimension_numbers = #tpu.dot_dimension_numbers<[1], [0], [0], [1], [0, 0, 1, 1], [], []>} : vector<2x32xf32>, vector<32x128xf32>, vector<2x128xf32> -> vector<2x128xf32>
    %224 = arith.addf %222, %223 : vector<2x128xf32>
    %225 = arith.negf %224 : vector<2x128xf32>
    %226 = math.exp %225 : vector<2x128xf32>
    %cst_87 = arith.constant 1.000000e+00 : f32
    %227 = vector.broadcast %cst_87 : f32 to vector<2x128xf32>
    %228 = arith.addf %227, %226 : vector<2x128xf32>
    %229 = arith.divf %227, %228 : vector<2x128xf32>
    %230 = math.tanh %224 : vector<2x128xf32>
    %231 = vector.extract_strided_slice %229 {offsets = [0, 0], sizes = [2, 32], strides = [1, 1]} : vector<2x128xf32> to vector<2x32xf32>
    %232 = vector.extract_strided_slice %229 {offsets = [0, 32], sizes = [2, 32], strides = [1, 1]} : vector<2x128xf32> to vector<2x32xf32>
    %233 = vector.extract_strided_slice %230 {offsets = [0, 64], sizes = [2, 32], strides = [1, 1]} : vector<2x128xf32> to vector<2x32xf32>
    %234 = vector.extract_strided_slice %229 {offsets = [0, 96], sizes = [2, 32], strides = [1, 1]} : vector<2x128xf32> to vector<2x32xf32>
    %235 = arith.mulf %232, %201 : vector<2x32xf32>
    %236 = arith.mulf %231, %233 : vector<2x32xf32>
    %237 = arith.addf %235, %236 : vector<2x32xf32>
    %238 = math.tanh %237 : vector<2x32xf32>
    %239 = arith.mulf %234, %238 : vector<2x32xf32>
    %240 = vector.extract_strided_slice %77 {offsets = [6, 0], sizes = [2, 128], strides = [1, 1]} : vector<16x128xf32> to vector<2x128xf32>
    %cst_88 = arith.constant dense<0.000000e+00> : vector<2x128xf32>
    %241 = tpu.matmul %221, %70, %cst_88 {dimension_numbers = #tpu.dot_dimension_numbers<[1], [0], [0], [1], [0, 0, 1, 1], [], []>} : vector<2x32xf32>, vector<32x128xf32>, vector<2x128xf32> -> vector<2x128xf32>
    %242 = arith.addf %240, %241 : vector<2x128xf32>
    %243 = arith.negf %242 : vector<2x128xf32>
    %244 = math.exp %243 : vector<2x128xf32>
    %cst_89 = arith.constant 1.000000e+00 : f32
    %245 = vector.broadcast %cst_89 : f32 to vector<2x128xf32>
    %246 = arith.addf %245, %244 : vector<2x128xf32>
    %247 = arith.divf %245, %246 : vector<2x128xf32>
    %248 = math.tanh %242 : vector<2x128xf32>
    %249 = vector.extract_strided_slice %247 {offsets = [0, 0], sizes = [2, 32], strides = [1, 1]} : vector<2x128xf32> to vector<2x32xf32>
    %250 = vector.extract_strided_slice %247 {offsets = [0, 32], sizes = [2, 32], strides = [1, 1]} : vector<2x128xf32> to vector<2x32xf32>
    %251 = vector.extract_strided_slice %248 {offsets = [0, 64], sizes = [2, 32], strides = [1, 1]} : vector<2x128xf32> to vector<2x32xf32>
    %252 = vector.extract_strided_slice %247 {offsets = [0, 96], sizes = [2, 32], strides = [1, 1]} : vector<2x128xf32> to vector<2x32xf32>
    %253 = arith.mulf %250, %219 : vector<2x32xf32>
    %254 = arith.mulf %249, %251 : vector<2x32xf32>
    %255 = arith.addf %253, %254 : vector<2x32xf32>
    %256 = math.tanh %255 : vector<2x32xf32>
    %257 = arith.mulf %252, %256 : vector<2x32xf32>
    %258 = vector.extract_strided_slice %74 {offsets = [10, 0], sizes = [2, 128], strides = [1, 1]} : vector<16x128xf32> to vector<2x128xf32>
    %cst_90 = arith.constant dense<0.000000e+00> : vector<2x128xf32>
    %259 = tpu.matmul %239, %67, %cst_90 {dimension_numbers = #tpu.dot_dimension_numbers<[1], [0], [0], [1], [0, 0, 1, 1], [], []>} : vector<2x32xf32>, vector<32x128xf32>, vector<2x128xf32> -> vector<2x128xf32>
    %260 = arith.addf %258, %259 : vector<2x128xf32>
    %261 = arith.negf %260 : vector<2x128xf32>
    %262 = math.exp %261 : vector<2x128xf32>
    %cst_91 = arith.constant 1.000000e+00 : f32
    %263 = vector.broadcast %cst_91 : f32 to vector<2x128xf32>
    %264 = arith.addf %263, %262 : vector<2x128xf32>
    %265 = arith.divf %263, %264 : vector<2x128xf32>
    %266 = math.tanh %260 : vector<2x128xf32>
    %267 = vector.extract_strided_slice %265 {offsets = [0, 0], sizes = [2, 32], strides = [1, 1]} : vector<2x128xf32> to vector<2x32xf32>
    %268 = vector.extract_strided_slice %265 {offsets = [0, 32], sizes = [2, 32], strides = [1, 1]} : vector<2x128xf32> to vector<2x32xf32>
    %269 = vector.extract_strided_slice %266 {offsets = [0, 64], sizes = [2, 32], strides = [1, 1]} : vector<2x128xf32> to vector<2x32xf32>
    %270 = vector.extract_strided_slice %265 {offsets = [0, 96], sizes = [2, 32], strides = [1, 1]} : vector<2x128xf32> to vector<2x32xf32>
    %271 = arith.mulf %268, %237 : vector<2x32xf32>
    %272 = arith.mulf %267, %269 : vector<2x32xf32>
    %273 = arith.addf %271, %272 : vector<2x32xf32>
    %274 = math.tanh %273 : vector<2x32xf32>
    %275 = arith.mulf %270, %274 : vector<2x32xf32>
    %276 = vector.extract_strided_slice %77 {offsets = [4, 0], sizes = [2, 128], strides = [1, 1]} : vector<16x128xf32> to vector<2x128xf32>
    %cst_92 = arith.constant dense<0.000000e+00> : vector<2x128xf32>
    %277 = tpu.matmul %257, %70, %cst_92 {dimension_numbers = #tpu.dot_dimension_numbers<[1], [0], [0], [1], [0, 0, 1, 1], [], []>} : vector<2x32xf32>, vector<32x128xf32>, vector<2x128xf32> -> vector<2x128xf32>
    %278 = arith.addf %276, %277 : vector<2x128xf32>
    %279 = arith.negf %278 : vector<2x128xf32>
    %280 = math.exp %279 : vector<2x128xf32>
    %cst_93 = arith.constant 1.000000e+00 : f32
    %281 = vector.broadcast %cst_93 : f32 to vector<2x128xf32>
    %282 = arith.addf %281, %280 : vector<2x128xf32>
    %283 = arith.divf %281, %282 : vector<2x128xf32>
    %284 = math.tanh %278 : vector<2x128xf32>
    %285 = vector.extract_strided_slice %283 {offsets = [0, 0], sizes = [2, 32], strides = [1, 1]} : vector<2x128xf32> to vector<2x32xf32>
    %286 = vector.extract_strided_slice %283 {offsets = [0, 32], sizes = [2, 32], strides = [1, 1]} : vector<2x128xf32> to vector<2x32xf32>
    %287 = vector.extract_strided_slice %284 {offsets = [0, 64], sizes = [2, 32], strides = [1, 1]} : vector<2x128xf32> to vector<2x32xf32>
    %288 = vector.extract_strided_slice %283 {offsets = [0, 96], sizes = [2, 32], strides = [1, 1]} : vector<2x128xf32> to vector<2x32xf32>
    %289 = arith.mulf %286, %255 : vector<2x32xf32>
    %290 = arith.mulf %285, %287 : vector<2x32xf32>
    %291 = arith.addf %289, %290 : vector<2x32xf32>
    %292 = math.tanh %291 : vector<2x32xf32>
    %293 = arith.mulf %288, %292 : vector<2x32xf32>
    %294 = vector.extract_strided_slice %74 {offsets = [12, 0], sizes = [2, 128], strides = [1, 1]} : vector<16x128xf32> to vector<2x128xf32>
    %cst_94 = arith.constant dense<0.000000e+00> : vector<2x128xf32>
    %295 = tpu.matmul %275, %67, %cst_94 {dimension_numbers = #tpu.dot_dimension_numbers<[1], [0], [0], [1], [0, 0, 1, 1], [], []>} : vector<2x32xf32>, vector<32x128xf32>, vector<2x128xf32> -> vector<2x128xf32>
    %296 = arith.addf %294, %295 : vector<2x128xf32>
    %297 = arith.negf %296 : vector<2x128xf32>
    %298 = math.exp %297 : vector<2x128xf32>
    %cst_95 = arith.constant 1.000000e+00 : f32
    %299 = vector.broadcast %cst_95 : f32 to vector<2x128xf32>
    %300 = arith.addf %299, %298 : vector<2x128xf32>
    %301 = arith.divf %299, %300 : vector<2x128xf32>
    %302 = math.tanh %296 : vector<2x128xf32>
    %303 = vector.extract_strided_slice %301 {offsets = [0, 0], sizes = [2, 32], strides = [1, 1]} : vector<2x128xf32> to vector<2x32xf32>
    %304 = vector.extract_strided_slice %301 {offsets = [0, 32], sizes = [2, 32], strides = [1, 1]} : vector<2x128xf32> to vector<2x32xf32>
    %305 = vector.extract_strided_slice %302 {offsets = [0, 64], sizes = [2, 32], strides = [1, 1]} : vector<2x128xf32> to vector<2x32xf32>
    %306 = vector.extract_strided_slice %301 {offsets = [0, 96], sizes = [2, 32], strides = [1, 1]} : vector<2x128xf32> to vector<2x32xf32>
    %307 = arith.mulf %304, %273 : vector<2x32xf32>
    %308 = arith.mulf %303, %305 : vector<2x32xf32>
    %309 = arith.addf %307, %308 : vector<2x32xf32>
    %310 = math.tanh %309 : vector<2x32xf32>
    %311 = arith.mulf %306, %310 : vector<2x32xf32>
    %312 = vector.extract_strided_slice %77 {offsets = [2, 0], sizes = [2, 128], strides = [1, 1]} : vector<16x128xf32> to vector<2x128xf32>
    %cst_96 = arith.constant dense<0.000000e+00> : vector<2x128xf32>
    %313 = tpu.matmul %293, %70, %cst_96 {dimension_numbers = #tpu.dot_dimension_numbers<[1], [0], [0], [1], [0, 0, 1, 1], [], []>} : vector<2x32xf32>, vector<32x128xf32>, vector<2x128xf32> -> vector<2x128xf32>
    %314 = arith.addf %312, %313 : vector<2x128xf32>
    %315 = arith.negf %314 : vector<2x128xf32>
    %316 = math.exp %315 : vector<2x128xf32>
    %cst_97 = arith.constant 1.000000e+00 : f32
    %317 = vector.broadcast %cst_97 : f32 to vector<2x128xf32>
    %318 = arith.addf %317, %316 : vector<2x128xf32>
    %319 = arith.divf %317, %318 : vector<2x128xf32>
    %320 = math.tanh %314 : vector<2x128xf32>
    %321 = vector.extract_strided_slice %319 {offsets = [0, 0], sizes = [2, 32], strides = [1, 1]} : vector<2x128xf32> to vector<2x32xf32>
    %322 = vector.extract_strided_slice %319 {offsets = [0, 32], sizes = [2, 32], strides = [1, 1]} : vector<2x128xf32> to vector<2x32xf32>
    %323 = vector.extract_strided_slice %320 {offsets = [0, 64], sizes = [2, 32], strides = [1, 1]} : vector<2x128xf32> to vector<2x32xf32>
    %324 = vector.extract_strided_slice %319 {offsets = [0, 96], sizes = [2, 32], strides = [1, 1]} : vector<2x128xf32> to vector<2x32xf32>
    %325 = arith.mulf %322, %291 : vector<2x32xf32>
    %326 = arith.mulf %321, %323 : vector<2x32xf32>
    %327 = arith.addf %325, %326 : vector<2x32xf32>
    %328 = math.tanh %327 : vector<2x32xf32>
    %329 = arith.mulf %324, %328 : vector<2x32xf32>
    %330 = vector.extract_strided_slice %74 {offsets = [14, 0], sizes = [2, 128], strides = [1, 1]} : vector<16x128xf32> to vector<2x128xf32>
    %cst_98 = arith.constant dense<0.000000e+00> : vector<2x128xf32>
    %331 = tpu.matmul %311, %67, %cst_98 {dimension_numbers = #tpu.dot_dimension_numbers<[1], [0], [0], [1], [0, 0, 1, 1], [], []>} : vector<2x32xf32>, vector<32x128xf32>, vector<2x128xf32> -> vector<2x128xf32>
    %332 = arith.addf %330, %331 : vector<2x128xf32>
    %333 = arith.negf %332 : vector<2x128xf32>
    %334 = math.exp %333 : vector<2x128xf32>
    %cst_99 = arith.constant 1.000000e+00 : f32
    %335 = vector.broadcast %cst_99 : f32 to vector<2x128xf32>
    %336 = arith.addf %335, %334 : vector<2x128xf32>
    %337 = arith.divf %335, %336 : vector<2x128xf32>
    %338 = math.tanh %332 : vector<2x128xf32>
    %339 = vector.extract_strided_slice %337 {offsets = [0, 0], sizes = [2, 32], strides = [1, 1]} : vector<2x128xf32> to vector<2x32xf32>
    %340 = vector.extract_strided_slice %337 {offsets = [0, 32], sizes = [2, 32], strides = [1, 1]} : vector<2x128xf32> to vector<2x32xf32>
    %341 = vector.extract_strided_slice %338 {offsets = [0, 64], sizes = [2, 32], strides = [1, 1]} : vector<2x128xf32> to vector<2x32xf32>
    %342 = vector.extract_strided_slice %337 {offsets = [0, 96], sizes = [2, 32], strides = [1, 1]} : vector<2x128xf32> to vector<2x32xf32>
    %343 = arith.mulf %340, %309 : vector<2x32xf32>
    %344 = arith.mulf %339, %341 : vector<2x32xf32>
    %345 = arith.addf %343, %344 : vector<2x32xf32>
    %346 = math.tanh %345 : vector<2x32xf32>
    %347 = arith.mulf %342, %346 : vector<2x32xf32>
    %348 = vector.extract_strided_slice %77 {offsets = [0, 0], sizes = [2, 128], strides = [1, 1]} : vector<16x128xf32> to vector<2x128xf32>
    %cst_100 = arith.constant dense<0.000000e+00> : vector<2x128xf32>
    %349 = tpu.matmul %329, %70, %cst_100 {dimension_numbers = #tpu.dot_dimension_numbers<[1], [0], [0], [1], [0, 0, 1, 1], [], []>} : vector<2x32xf32>, vector<32x128xf32>, vector<2x128xf32> -> vector<2x128xf32>
    %350 = arith.addf %348, %349 : vector<2x128xf32>
    %351 = arith.negf %350 : vector<2x128xf32>
    %352 = math.exp %351 : vector<2x128xf32>
    %cst_101 = arith.constant 1.000000e+00 : f32
    %353 = vector.broadcast %cst_101 : f32 to vector<2x128xf32>
    %354 = arith.addf %353, %352 : vector<2x128xf32>
    %355 = arith.divf %353, %354 : vector<2x128xf32>
    %356 = math.tanh %350 : vector<2x128xf32>
    %357 = vector.extract_strided_slice %355 {offsets = [0, 0], sizes = [2, 32], strides = [1, 1]} : vector<2x128xf32> to vector<2x32xf32>
    %358 = vector.extract_strided_slice %355 {offsets = [0, 32], sizes = [2, 32], strides = [1, 1]} : vector<2x128xf32> to vector<2x32xf32>
    %359 = vector.extract_strided_slice %356 {offsets = [0, 64], sizes = [2, 32], strides = [1, 1]} : vector<2x128xf32> to vector<2x32xf32>
    %360 = vector.extract_strided_slice %355 {offsets = [0, 96], sizes = [2, 32], strides = [1, 1]} : vector<2x128xf32> to vector<2x32xf32>
    %361 = arith.mulf %358, %327 : vector<2x32xf32>
    %362 = arith.mulf %357, %359 : vector<2x32xf32>
    %363 = arith.addf %361, %362 : vector<2x32xf32>
    %364 = math.tanh %363 : vector<2x32xf32>
    %365 = arith.mulf %360, %364 : vector<2x32xf32>
    %366 = arith.addf %95, %131 : vector<2x32xf32>
    %367 = arith.addf %365, %329 : vector<2x32xf32>
    %368 = arith.addf %366, %167 : vector<2x32xf32>
    %369 = arith.addf %367, %293 : vector<2x32xf32>
    %370 = arith.addf %368, %203 : vector<2x32xf32>
    %371 = arith.addf %369, %257 : vector<2x32xf32>
    %372 = arith.addf %370, %239 : vector<2x32xf32>
    %373 = arith.addf %371, %221 : vector<2x32xf32>
    %374 = arith.addf %372, %275 : vector<2x32xf32>
    %375 = arith.addf %373, %185 : vector<2x32xf32>
    %376 = arith.addf %374, %311 : vector<2x32xf32>
    %377 = arith.addf %375, %149 : vector<2x32xf32>
    %378 = arith.addf %376, %347 : vector<2x32xf32>
    %379 = arith.addf %377, %113 : vector<2x32xf32>
    %380 = tpu.concatenate %378, %379 in 1 : vector<2x32xf32>, vector<2x32xf32> -> vector<2x64xf32>
    %cst_102 = arith.constant 1.250000e-01 : f32
    %381 = vector.broadcast %cst_102 : f32 to vector<2x64xf32>
    %382 = arith.mulf %380, %381 : vector<2x64xf32>
    %383 = tpu.concatenate %95, %131, %167, %203, %239, %275, %311, %347 in 0 : vector<2x32xf32>, vector<2x32xf32>, vector<2x32xf32>, vector<2x32xf32>, vector<2x32xf32>, vector<2x32xf32>, vector<2x32xf32>, vector<2x32xf32> -> vector<16x32xf32>
    %384 = tpu.concatenate %365, %329, %293, %257, %221, %185, %149, %113 in 0 : vector<2x32xf32>, vector<2x32xf32>, vector<2x32xf32>, vector<2x32xf32>, vector<2x32xf32>, vector<2x32xf32>, vector<2x32xf32>, vector<2x32xf32> -> vector<16x32xf32>
    %385 = tpu.concatenate %383, %384 in 1 : vector<16x32xf32>, vector<16x32xf32> -> vector<16x64xf32>
    %c0_103 = arith.constant 0 : index
    %c0_104 = arith.constant 0 : index
    %386 = vector.load %arg10[%c0_103, %c0_104] : memref<1x32xf32, #tpu.memory_space<vmem>>, vector<1x32xf32>
    %387 = vector.extract_strided_slice %385 {offsets = [0, 0], sizes = [12, 64], strides = [1, 1]} : vector<16x64xf32> to vector<12x64xf32>
    %c0_105 = arith.constant 0 : index
    %c0_106 = arith.constant 0 : index
    %c0_107 = arith.constant 0 : index
    %388 = vector.load %arg9[%c0_105, %c0_106, %c0_107] : memref<3x64x32xf32, #tpu.memory_space<vmem>>, vector<1x64x32xf32>
    %389 = vector.shape_cast %388 : vector<1x64x32xf32> to vector<64x32xf32>
    %cst_108 = arith.constant dense<0.000000e+00> : vector<12x32xf32>
    %390 = tpu.matmul %387, %389, %cst_108 {dimension_numbers = #tpu.dot_dimension_numbers<[1], [0], [0], [1], [0, 0, 1, 1], [], []>} : vector<12x64xf32>, vector<64x32xf32>, vector<12x32xf32> -> vector<12x32xf32>
    %391 = vector.extract_strided_slice %385 {offsets = [2, 0], sizes = [12, 64], strides = [1, 1]} : vector<16x64xf32> to vector<12x64xf32>
    %c1_109 = arith.constant 1 : index
    %c0_110 = arith.constant 0 : index
    %c0_111 = arith.constant 0 : index
    %392 = vector.load %arg9[%c1_109, %c0_110, %c0_111] : memref<3x64x32xf32, #tpu.memory_space<vmem>>, vector<1x64x32xf32>
    %393 = vector.shape_cast %392 : vector<1x64x32xf32> to vector<64x32xf32>
    %cst_112 = arith.constant dense<0.000000e+00> : vector<12x32xf32>
    %394 = tpu.matmul %391, %393, %cst_112 {dimension_numbers = #tpu.dot_dimension_numbers<[1], [0], [0], [1], [0, 0, 1, 1], [], []>} : vector<12x64xf32>, vector<64x32xf32>, vector<12x32xf32> -> vector<12x32xf32>
    %395 = arith.addf %390, %394 : vector<12x32xf32>
    %396 = vector.extract_strided_slice %385 {offsets = [4, 0], sizes = [12, 64], strides = [1, 1]} : vector<16x64xf32> to vector<12x64xf32>
    %c2_113 = arith.constant 2 : index
    %c0_114 = arith.constant 0 : index
    %c0_115 = arith.constant 0 : index
    %397 = vector.load %arg9[%c2_113, %c0_114, %c0_115] : memref<3x64x32xf32, #tpu.memory_space<vmem>>, vector<1x64x32xf32>
    %398 = vector.shape_cast %397 : vector<1x64x32xf32> to vector<64x32xf32>
    %cst_116 = arith.constant dense<0.000000e+00> : vector<12x32xf32>
    %399 = tpu.matmul %396, %398, %cst_116 {dimension_numbers = #tpu.dot_dimension_numbers<[1], [0], [0], [1], [0, 0, 1, 1], [], []>} : vector<12x64xf32>, vector<64x32xf32>, vector<12x32xf32> -> vector<12x32xf32>
    %400 = arith.addf %395, %399 : vector<12x32xf32>
    %401 = vector.broadcast %386 : vector<1x32xf32> to vector<12x32xf32>
    %402 = arith.addf %400, %401 : vector<12x32xf32>
    %cst_117 = arith.constant 0.000000e+00 : f32
    %403 = vector.broadcast %cst_117 : f32 to vector<12x32xf32>
    %404 = arith.maximumf %402, %403 : vector<12x32xf32>
    %405 = vector.extract_strided_slice %404 {offsets = [0, 0], sizes = [2, 32], strides = [1, 1]} : vector<12x32xf32> to vector<2x32xf32>
    %406 = vector.extract_strided_slice %404 {offsets = [2, 0], sizes = [2, 32], strides = [1, 1]} : vector<12x32xf32> to vector<2x32xf32>
    %407 = arith.maximumf %405, %406 : vector<2x32xf32>
    %408 = vector.extract_strided_slice %404 {offsets = [4, 0], sizes = [2, 32], strides = [1, 1]} : vector<12x32xf32> to vector<2x32xf32>
    %409 = arith.maximumf %407, %408 : vector<2x32xf32>
    %410 = vector.extract_strided_slice %404 {offsets = [6, 0], sizes = [2, 32], strides = [1, 1]} : vector<12x32xf32> to vector<2x32xf32>
    %411 = arith.maximumf %409, %410 : vector<2x32xf32>
    %412 = vector.extract_strided_slice %404 {offsets = [8, 0], sizes = [2, 32], strides = [1, 1]} : vector<12x32xf32> to vector<2x32xf32>
    %413 = arith.maximumf %411, %412 : vector<2x32xf32>
    %414 = vector.extract_strided_slice %404 {offsets = [10, 0], sizes = [2, 32], strides = [1, 1]} : vector<12x32xf32> to vector<2x32xf32>
    %415 = arith.maximumf %413, %414 : vector<2x32xf32>
    %c0_118 = arith.constant 0 : index
    %c0_119 = arith.constant 0 : index
    %416 = vector.load %arg12[%c0_118, %c0_119] : memref<1x32xf32, #tpu.memory_space<vmem>>, vector<1x32xf32>
    %417 = vector.extract_strided_slice %385 {offsets = [0, 0], sizes = [10, 64], strides = [1, 1]} : vector<16x64xf32> to vector<10x64xf32>
    %c0_120 = arith.constant 0 : index
    %c0_121 = arith.constant 0 : index
    %c0_122 = arith.constant 0 : index
    %418 = vector.load %arg11[%c0_120, %c0_121, %c0_122] : memref<4x64x32xf32, #tpu.memory_space<vmem>>, vector<1x64x32xf32>
    %419 = vector.shape_cast %418 : vector<1x64x32xf32> to vector<64x32xf32>
    %cst_123 = arith.constant dense<0.000000e+00> : vector<10x32xf32>
    %420 = tpu.matmul %417, %419, %cst_123 {dimension_numbers = #tpu.dot_dimension_numbers<[1], [0], [0], [1], [0, 0, 1, 1], [], []>} : vector<10x64xf32>, vector<64x32xf32>, vector<10x32xf32> -> vector<10x32xf32>
    %421 = vector.extract_strided_slice %385 {offsets = [2, 0], sizes = [10, 64], strides = [1, 1]} : vector<16x64xf32> to vector<10x64xf32>
    %c1_124 = arith.constant 1 : index
    %c0_125 = arith.constant 0 : index
    %c0_126 = arith.constant 0 : index
    %422 = vector.load %arg11[%c1_124, %c0_125, %c0_126] : memref<4x64x32xf32, #tpu.memory_space<vmem>>, vector<1x64x32xf32>
    %423 = vector.shape_cast %422 : vector<1x64x32xf32> to vector<64x32xf32>
    %cst_127 = arith.constant dense<0.000000e+00> : vector<10x32xf32>
    %424 = tpu.matmul %421, %423, %cst_127 {dimension_numbers = #tpu.dot_dimension_numbers<[1], [0], [0], [1], [0, 0, 1, 1], [], []>} : vector<10x64xf32>, vector<64x32xf32>, vector<10x32xf32> -> vector<10x32xf32>
    %425 = arith.addf %420, %424 : vector<10x32xf32>
    %426 = vector.extract_strided_slice %385 {offsets = [4, 0], sizes = [10, 64], strides = [1, 1]} : vector<16x64xf32> to vector<10x64xf32>
    %c2_128 = arith.constant 2 : index
    %c0_129 = arith.constant 0 : index
    %c0_130 = arith.constant 0 : index
    %427 = vector.load %arg11[%c2_128, %c0_129, %c0_130] : memref<4x64x32xf32, #tpu.memory_space<vmem>>, vector<1x64x32xf32>
    %428 = vector.shape_cast %427 : vector<1x64x32xf32> to vector<64x32xf32>
    %cst_131 = arith.constant dense<0.000000e+00> : vector<10x32xf32>
    %429 = tpu.matmul %426, %428, %cst_131 {dimension_numbers = #tpu.dot_dimension_numbers<[1], [0], [0], [1], [0, 0, 1, 1], [], []>} : vector<10x64xf32>, vector<64x32xf32>, vector<10x32xf32> -> vector<10x32xf32>
    %430 = arith.addf %425, %429 : vector<10x32xf32>
    %431 = vector.extract_strided_slice %385 {offsets = [6, 0], sizes = [10, 64], strides = [1, 1]} : vector<16x64xf32> to vector<10x64xf32>
    %c3_132 = arith.constant 3 : index
    %c0_133 = arith.constant 0 : index
    %c0_134 = arith.constant 0 : index
    %432 = vector.load %arg11[%c3_132, %c0_133, %c0_134] : memref<4x64x32xf32, #tpu.memory_space<vmem>>, vector<1x64x32xf32>
    %433 = vector.shape_cast %432 : vector<1x64x32xf32> to vector<64x32xf32>
    %cst_135 = arith.constant dense<0.000000e+00> : vector<10x32xf32>
    %434 = tpu.matmul %431, %433, %cst_135 {dimension_numbers = #tpu.dot_dimension_numbers<[1], [0], [0], [1], [0, 0, 1, 1], [], []>} : vector<10x64xf32>, vector<64x32xf32>, vector<10x32xf32> -> vector<10x32xf32>
    %435 = arith.addf %430, %434 : vector<10x32xf32>
    %436 = vector.broadcast %416 : vector<1x32xf32> to vector<10x32xf32>
    %437 = arith.addf %435, %436 : vector<10x32xf32>
    %cst_136 = arith.constant 0.000000e+00 : f32
    %438 = vector.broadcast %cst_136 : f32 to vector<10x32xf32>
    %439 = arith.maximumf %437, %438 : vector<10x32xf32>
    %440 = vector.extract_strided_slice %439 {offsets = [0, 0], sizes = [2, 32], strides = [1, 1]} : vector<10x32xf32> to vector<2x32xf32>
    %441 = vector.extract_strided_slice %439 {offsets = [2, 0], sizes = [2, 32], strides = [1, 1]} : vector<10x32xf32> to vector<2x32xf32>
    %442 = arith.maximumf %440, %441 : vector<2x32xf32>
    %443 = vector.extract_strided_slice %439 {offsets = [4, 0], sizes = [2, 32], strides = [1, 1]} : vector<10x32xf32> to vector<2x32xf32>
    %444 = arith.maximumf %442, %443 : vector<2x32xf32>
    %445 = vector.extract_strided_slice %439 {offsets = [6, 0], sizes = [2, 32], strides = [1, 1]} : vector<10x32xf32> to vector<2x32xf32>
    %446 = arith.maximumf %444, %445 : vector<2x32xf32>
    %447 = vector.extract_strided_slice %439 {offsets = [8, 0], sizes = [2, 32], strides = [1, 1]} : vector<10x32xf32> to vector<2x32xf32>
    %448 = arith.maximumf %446, %447 : vector<2x32xf32>
    %449 = tpu.concatenate %415, %448 in 1 : vector<2x32xf32>, vector<2x32xf32> -> vector<2x64xf32>
    %450 = arith.addf %382, %449 : vector<2x64xf32>
    %c0_137 = arith.constant 0 : index
    %c0_138 = arith.constant 0 : index
    %451 = vector.load %arg13[%c0_137, %c0_138] : memref<64x1xf32, #tpu.memory_space<vmem>>, vector<64x1xf32>
    %cst_139 = arith.constant dense<0.000000e+00> : vector<2x1xf32>
    %452 = tpu.matmul %450, %451, %cst_139 {dimension_numbers = #tpu.dot_dimension_numbers<[1], [0], [0], [1], [0, 0, 1, 1], [], []>} : vector<2x64xf32>, vector<64x1xf32>, vector<2x1xf32> -> vector<2x1xf32>
    %c0_140 = arith.constant 0 : index
    %c0_141 = arith.constant 0 : index
    %453 = vector.load %arg14[%c0_140, %c0_141] : memref<1x1xf32, #tpu.memory_space<vmem>>, vector<1x1xf32>
    %454 = vector.broadcast %453 : vector<1x1xf32> to vector<2x1xf32>
    %455 = arith.addf %452, %454 : vector<2x1xf32>
    %456 = arith.negf %455 : vector<2x1xf32>
    %457 = math.exp %456 : vector<2x1xf32>
    %cst_142 = arith.constant 1.000000e+00 : f32
    %458 = vector.broadcast %cst_142 : f32 to vector<2x1xf32>
    %459 = arith.addf %458, %457 : vector<2x1xf32>
    %460 = arith.divf %458, %459 : vector<2x1xf32>
    %c0_143 = arith.constant 0 : index
    %c0_144 = arith.constant 0 : index
    %461 = vector.load %arg15[%c0_143, %c0_144] : memref<2x1xf32, #tpu.memory_space<vmem>>, vector<2x1xf32>
    tpu.vector_store %arg15[%c0_143, %c0_144], %460 {strides = array<i32>} : memref<2x1xf32, #tpu.memory_space<vmem>>, vector<2x1xf32>,
    return
  }
  func.func @transform_0(%arg0: i32, %arg1: memref<2x8xi32, #tpu.memory_space<smem>>) -> (i32, i32, i32) {
    %c0_i32 = arith.constant 0 : i32
    %c0_i32_0 = arith.constant 0 : i32
    %c0_i32_1 = arith.constant 0 : i32
    %c0_i32_2 = arith.constant 0 : i32
    return %c0_i32, %c0_i32_0, %c0_i32_1 : i32, i32, i32
  }
  func.func @transform_1(%arg0: i32, %arg1: memref<2x8xi32, #tpu.memory_space<smem>>) -> (i32, i32) {
    %c0_i32 = arith.constant 0 : i32
    %c0_i32_0 = arith.constant 0 : i32
    %c0_i32_1 = arith.constant 0 : i32
    return %c0_i32, %c0_i32_0 : i32, i32
  }
  func.func @transform_2(%arg0: i32, %arg1: memref<2x8xi32, #tpu.memory_space<smem>>) -> (i32, i32) {
    %c0_i32 = arith.constant 0 : i32
    %c0_i32_0 = arith.constant 0 : i32
    %c0_i32_1 = arith.constant 0 : i32
    return %c0_i32, %c0_i32_0 : i32, i32
  }
  func.func @transform_3(%arg0: i32, %arg1: memref<2x8xi32, #tpu.memory_space<smem>>) -> (i32, i32) {
    %c0_i32 = arith.constant 0 : i32
    %c0_i32_0 = arith.constant 0 : i32
    %c0_i32_1 = arith.constant 0 : i32
    return %c0_i32, %c0_i32_0 : i32, i32
  }
  func.func @transform_4(%arg0: i32, %arg1: memref<2x8xi32, #tpu.memory_space<smem>>) -> (i32, i32) {
    %c0_i32 = arith.constant 0 : i32
    %c0_i32_0 = arith.constant 0 : i32
    %c0_i32_1 = arith.constant 0 : i32
    return %c0_i32, %c0_i32_0 : i32, i32
  }
  func.func @transform_5(%arg0: i32, %arg1: memref<2x8xi32, #tpu.memory_space<smem>>) -> (i32, i32) {
    %c0_i32 = arith.constant 0 : i32
    %c0_i32_0 = arith.constant 0 : i32
    %c0_i32_1 = arith.constant 0 : i32
    return %c0_i32, %c0_i32_0 : i32, i32
  }
  func.func @transform_6(%arg0: i32, %arg1: memref<2x8xi32, #tpu.memory_space<smem>>) -> (i32, i32) {
    %c0_i32 = arith.constant 0 : i32
    %c0_i32_0 = arith.constant 0 : i32
    %c0_i32_1 = arith.constant 0 : i32
    return %c0_i32, %c0_i32_0 : i32, i32
  }
  func.func @transform_7(%arg0: i32, %arg1: memref<2x8xi32, #tpu.memory_space<smem>>) -> (i32, i32, i32) {
    %c0_i32 = arith.constant 0 : i32
    %c0_i32_0 = arith.constant 0 : i32
    %c0_i32_1 = arith.constant 0 : i32
    %c0_i32_2 = arith.constant 0 : i32
    return %c0_i32, %c0_i32_0, %c0_i32_1 : i32, i32, i32
  }
  func.func @transform_8(%arg0: i32, %arg1: memref<2x8xi32, #tpu.memory_space<smem>>) -> (i32, i32) {
    %c0_i32 = arith.constant 0 : i32
    %c0_i32_0 = arith.constant 0 : i32
    %c0_i32_1 = arith.constant 0 : i32
    return %c0_i32, %c0_i32_0 : i32, i32
  }
  func.func @transform_9(%arg0: i32, %arg1: memref<2x8xi32, #tpu.memory_space<smem>>) -> (i32, i32, i32) {
    %c0_i32 = arith.constant 0 : i32
    %c0_i32_0 = arith.constant 0 : i32
    %c0_i32_1 = arith.constant 0 : i32
    %c0_i32_2 = arith.constant 0 : i32
    return %c0_i32, %c0_i32_0, %c0_i32_1 : i32, i32, i32
  }
  func.func @transform_10(%arg0: i32, %arg1: memref<2x8xi32, #tpu.memory_space<smem>>) -> (i32, i32) {
    %c0_i32 = arith.constant 0 : i32
    %c0_i32_0 = arith.constant 0 : i32
    %c0_i32_1 = arith.constant 0 : i32
    return %c0_i32, %c0_i32_0 : i32, i32
  }
  func.func @transform_11(%arg0: i32, %arg1: memref<2x8xi32, #tpu.memory_space<smem>>) -> (i32, i32) {
    %c0_i32 = arith.constant 0 : i32
    %c0_i32_0 = arith.constant 0 : i32
    %c0_i32_1 = arith.constant 0 : i32
    return %c0_i32, %c0_i32_0 : i32, i32
  }
  func.func @transform_12(%arg0: i32, %arg1: memref<2x8xi32, #tpu.memory_space<smem>>) -> (i32, i32) {
    %c0_i32 = arith.constant 0 : i32
    %c0_i32_0 = arith.constant 0 : i32
    %c0_i32_1 = arith.constant 0 : i32
    return %c0_i32, %c0_i32_0 : i32, i32
  }
  func.func @transform_13(%arg0: i32, %arg1: memref<2x8xi32, #tpu.memory_space<smem>>) -> (i32, i32) {
    %c0_i32 = arith.constant 0 : i32
    %c0_i32_0 = arith.constant 0 : i32
    %c0_i32_1 = arith.constant 0 : i32
    return %c0_i32, %c0_i32_0 : i32, i32
  }
}

</mosaic_0001>

<bundles_post_ra>
// kernel: _lambda_.1
= control target key start
LH: loop header
LB: loop body
LE: loop exit
PB: predicated region body
PF: predicated region fallthrough
CT: control target
= control target key end

     0   :  { %s4788_s0 = inlined_call_operand.vmem [shape: s32[2,8], index: 0, kind: input, shape index: {}]   ;;  %s4789_s1 = inlined_call_operand.vmem [shape: f32[50,1,16], index: 1, kind: input, shape index: {}]   ;;  %s4790_s2 = inlined_call_operand.vmem [shape: f32[16,128], index: 2, kind: input, shape index: {}]   ;;  %s4791_s3 = inlined_call_operand.vmem [shape: f32[32,128], index: 3, kind: input, shape index: {}]   ;;  %s4792_s4 = inlined_call_operand.vmem [shape: f32[1,128], index: 4, kind: input, shape index: {}]   ;;  %s4793_s5 = inlined_call_operand.vmem [shape: f32[16,128], index: 5, kind: input, shape index: {}]   ;;  %s4794_s6 = inlined_call_operand.vmem [shape: f32[32,128], index: 6, kind: input, shape index: {}]   ;;  %s4795_s7 = inlined_call_operand.vmem [shape: f32[1,128], index: 7, kind: input, shape index: {}]   ;;  %s4796_s8 = inlined_call_operand.vmem [shape: f32[3,64,32], index: 8, kind: input, shape index: {}]   ;;  %s4797_s9 = inlined_call_operand.vmem [shape: f32[1,32], index: 9, kind: input, shape index: {}]   ;;  %s4798_s10 = inlined_call_operand.vmem [shape: f32[4,64,32], index: 10, kind: input, shape index: {}]   ;;  %s4799_s11 = inlined_call_operand.vmem [shape: f32[1,32], index: 11, kind: input, shape index: {}]   ;;  %s4800_s12 = inlined_call_operand.vmem [shape: f32[64,1], index: 12, kind: input, shape index: {}]   ;;  %s4801_s14 = inlined_call_operand.vmem [shape: f32[2,1], index: 14, kind: output, shape index: {}]   ;;  %s4802_s13 = inlined_call_operand.<no memory space> [shape: f32[1,1], index: 13, kind: input, shape index: {}]  }
   0x1   :  { %4803 = sst [smem:[#allocation6_spill]] %s4799_s11  ;;  %s19_s15 = sshll.u32 %s4788_s0, 4  ;;  %v23_v0 = vstv %s4802_s13  ;;  %s20_s15 = int_to_ptr.vmem [resolvable:$true] %s19_s15 }
   0x2   :  { %4804 = sst [smem:[#allocation7_spill]] %s4801_s14  ;;  %24 = vst [vmem:[#allocation4] sm:$0x1] %v23_v0  ;;  %s3939_s18 = scalar_lea.vmem %s20_s15, 32 }
   0x3   :  { %p3940_p0 = scmp.ne.s32.totalorder %s20_s15, %s3939_s18  ;;  %p3944_p1 = scmp.lt.s32.totalorder %s20_s15, %s20_s15 }
   0x4   :  { %p3945_p2 = scmp.lt.s32.totalorder %s3939_s18, %s3939_s18 }
   0x6   :  { %p3946_p3 = por %p3945_p2, %p3944_p1 }
   0x8   :  { %p3947_p4 = pnand %p3946_p3, %p3940_p0 }
   0xa   :  { %3950 = shalt.err (!%p3947_p4)  }
   0xb   :  { %s3953_s19 = smov [#allocation3]  }
   0xc   :  { %22 = dma.vmem_to_smem %s20_s15, 32, %s3953_s19, [#allocation2] }
   0xd   :  { %3951 = dma.done.wait [#allocation2], 32 }
   0xe   :  { %3952 = vsyncadd [#allocation2], 4294967264 }
   0xf   :  { %26 = sfence }
  0x10   :  { %v213_v1 = vld [vmem:[%s4793_s5] sm:$0xff]  ;;  %v214_v2 = vld [vmem:[%s4793_s5 + $0x8] sm:$0xff]  ;;  %s53_s24 = sld [smem:[#allocation3]]  ;;  %s2931_s28 = sld [smem:[#allocation3 + $0x1]]  ;;  %v3954_v7 = vmov 0.0|0.0   ;;  %vm185_vm0 = vcmask 1040384  }
  0x11   :  { %v206_v3 = vld [vmem:[%s4790_s2] sm:$0xff]  ;;  %v3567_v4 = vpack.c.bf16 %v214_v2, %v213_v1  ;;  %v207_v5 = vld [vmem:[%s4790_s2 + $0x8] sm:$0xff]  ;;  %s2930_s27 = sld [smem:[#allocation3 + $0x80]]  ;;  %s2932_s29 = sld [smem:[#allocation3 + $0x81]]  ;;  %vm187_vm1 = vcmask 1041408   ;;  %vm189_vm2 = vcmask 1042432  }
  0x12   :  { %v3563_v6 = vpack.c.bf16 %v207_v5, %v206_v3  ;;  %s2933_s30 = sld [smem:[#allocation3 + $0x2]]  ;;  %s4054_s16 = sld [smem:[#allocation3 + $0x3]]  ;;  %vm191_vm3 = vcmask 1043456   ;;  %vm193_vm4 = vcmask 1044480   ;;  %vm195_vm5 = vcmask 1045504   ;;  %v215_v29 = vld [vmem:[%s4794_s6] sm:$0xff] }
  0x13   :  { %3568 = vmatprep.subr.bf16.mxu1 %v3567_v4  ;;  %s4052_s15 = sld [smem:[#allocation3 + $0x82]]  ;;  %s4056_s5 = sld [smem:[#allocation3 + $0x83]]  ;;  %vm197_vm6 = vcmask 1046528   ;;  %vm226_vm7 = vcmask 130048   ;;  %v216_v31 = vld [vmem:[%s4794_s6 + $0x8] sm:$0xff]  ;;  %v208_v32 = vld [vmem:[%s4791_s3] sm:$0xff] }
  0x14   :  { %3564 = vmatprep.subr.bf16.mxu0 %v3563_v6  ;;  %3570 = vmatpush3.bf16.msra.mxu1 %v3567_v4  ;;  %s4059_s17 = sld [smem:[#allocation3 + $0x4]]  ;;  %s4066_s0 = sld [smem:[#allocation3 + $0x5]]  ;;  %v209_v33 = vld [vmem:[%s4791_s3 + $0x8] sm:$0xff]  ;;  %v4146_v40 = vpack.c.bf16 %v216_v31, %v215_v29  ;;  %v217_v42 = vld [vmem:[%s4794_s6 + $0x10] sm:$0xff]  ;;  %v218_v44 = vld [vmem:[%s4794_s6 + $0x18] sm:$0xff]  ;;  %vm3955_vm8 = vmmov 0  }
  0x15   :  { %3566 = vmatpush3.bf16.msra.mxu0 %v3563_v6  ;;  %3577 = vmatprep.subr.bf16.mxu1 %v3954_v7  ;;  %s4061_s2 = sld [smem:[#allocation3 + $0x84]]  ;;  %s2941_s21 = sld [smem:[#allocation3 + $0x6]]  ;;  %v4148_v41 = vpack.c.bf16 %v209_v33, %v208_v32  ;;  %v210_v45 = vld [vmem:[%s4791_s3 + $0x10] sm:$0xff]  ;;  %v211_v46 = vld [vmem:[%s4791_s3 + $0x18] sm:$0xff]  ;;  %v4168_v48 = vpack.c.bf16 %v218_v44, %v217_v42  ;;  %v3956_v50 = vmov 0.0   ;;  %vm389_vm9 = vcmask 261120  }
  0x16   :  { %s54_s20 = scalar_lea.vmem %s4789_s1, %s53_s24  ;;  %3571 = vmatprep.subr.bf16.mxu0 %v3954_v7  ;;  %s60_s26 = scalar_lea.vmem %s4789_s1, %s2931_s28  ;;  %v4170_v49 = vpack.c.bf16 %v211_v46, %v210_v45  ;;  %v2959_v51 = vld [vmem:[%s4792_s4] ss:$0 sm:$0xff]  ;;  %vm2163_vm10 = vcmask 523264   ;;  %vm2908_vm11 = vcmask 1024  }
  0x17   :  { %v55_v8 = vld [vmem:[%s54_s20] sm:$0x1]  ;;  %s57_s22 = scalar_lea.vmem %s4789_s1, %s2930_s27  ;;  %s63_s19 = scalar_lea.vmem %s4789_s1, %s2932_s29 }
  0x18   :  { %v2945_v9 = vld [vmem:[%s57_s22] ss:$0 sm:$0xff]  ;;  %s66_s20 = scalar_lea.vmem %s4789_s1, %s2933_s30  ;;  %s72_s22 = scalar_lea.vmem %s4789_s1, %s4054_s16 }
  0x19   :  { %v2946_v10 = vld [vmem:[%s60_s26] ss:$0 sm:$0xff]  ;;  %s69_s13 = scalar_lea.vmem %s4789_s1, %s4052_s15  ;;  %v186_v13 = vsel %vm185_vm0, %v55_v8, %v2945_v9  ;;  %s75_s14 = scalar_lea.vmem %s4789_s1, %s4056_s5 }
  0x1a   :  { %v2947_v11 = vld [vmem:[%s63_s19] ss:$0 sm:$0xff]  ;;  %v188_v15 = vsel %vm187_vm1, %v186_v13, %v2946_v10  ;;  %s2940_s30 = sld [smem:[#allocation3 + $0x85]]  ;;  %s78_s25 = scalar_lea.vmem %s4789_s1, %s4059_s17 }
  0x1b   :  { %v2948_v12 = vld [vmem:[%s66_s20] ss:$0 sm:$0xff]  ;;  %v190_v18 = vsel %vm189_vm2, %v188_v15, %v2947_v11  ;;  %s81_s18 = scalar_lea.vmem %s4789_s1, %s4061_s2  ;;  %s84_s20 = scalar_lea.vmem %s4789_s1, %s4066_s0 }
  0x1c   :  { %v2949_v14 = vld [vmem:[%s69_s13] ss:$0 sm:$0xff]  ;;  %v192_v19 = vsel %vm191_vm3, %v190_v18, %v2948_v12  ;;  %s2942_s27 = sld [smem:[#allocation3 + $0x86]]  ;;  %s2943_s13 = sld [smem:[#allocation3 + $0x7]] }
  0x1d   :  { %v2950_v16 = vld [vmem:[%s72_s22] ss:$0 sm:$0xff]  ;;  %v194_v22 = vsel %vm193_vm4, %v192_v19, %v2949_v14  ;;  %s2944_s17 = sld [smem:[#allocation3 + $0x87]]  ;;  %s3957_s4 = smov 64  }
  0x1e   :  { %v2951_v17 = vld [vmem:[%s75_s14] ss:$0 sm:$0xff]  ;;  %v196_v25 = vsel %vm195_vm5, %v194_v22, %v2950_v16  ;;  %s90_s14 = scalar_lea.vmem %s4789_s1, %s2941_s21  ;;  %s4805_s3 = sld [smem:[#allocation6_spill]] }
  0x1f   :  { %v79_v20 = vld [vmem:[%s78_s25] sm:$0x1]  ;;  %v198_v26 = vsel %vm197_vm6, %v196_v25, %v2951_v17  ;;  %s4806_s25 = sld [smem:[#allocation7_spill]] }
  0x20   :  { %v2952_v21 = vld [vmem:[%s81_s18] ss:$0 sm:$0xff]  ;;  %3232 = vmatprep.mubr.msk.f32.mxu1 %vm226_vm7, %v198_v26  ;;  %3225 = vmatprep.mubr.msk.f32.mxu0 %vm226_vm7, %v198_v26  ;;  %s87_s28 = scalar_lea.vmem %s4789_s1, %s2940_s30 }
  0x21   :  { %v2953_v23 = vld [vmem:[%s84_s20] ss:$0 sm:$0xff]  ;;  %v199_v24 = vsel %vm185_vm0, %v79_v20, %v2952_v21 }
  0x22   :  { %v200_v27 = vsel %vm187_vm1, %v199_v24, %v2953_v23  ;;  %v2954_v28 = vld [vmem:[%s87_s28] ss:$0 sm:$0xff]  ;;  %s93_s19 = scalar_lea.vmem %s4789_s1, %s2942_s27  ;;  %s96_s2 = scalar_lea.vmem %s4789_s1, %s2943_s13 }
  0x23   :  { %v201_v30 = vsel %vm189_vm2, %v200_v27, %v2954_v28  ;;  %v2955_v34 = vld [vmem:[%s90_s14] ss:$0 sm:$0xff]  ;;  %s99_s23 = scalar_lea.vmem %s4789_s1, %s2944_s17 }
  0x24   :  { %v2956_v35 = vld [vmem:[%s93_s19] ss:$0 sm:$0xff]  ;;  %v202_v37 = vsel %vm191_vm3, %v201_v30, %v2955_v34 }
  0x25   :  { %v2957_v36 = vld [vmem:[%s96_s2] ss:$0 sm:$0xff]  ;;  %v203_v39 = vsel %vm193_vm4, %v202_v37, %v2956_v35 }
  0x26   :  { %v2958_v38 = vld [vmem:[%s99_s23] ss:$0 sm:$0xff]  ;;  %v204_v43 = vsel %vm195_vm5, %v203_v39, %v2957_v36 }
  0x27   :  { %v205_v47 = vsel %vm197_vm6, %v204_v43, %v2958_v38  ;;  %v2962_v52 = vld [vmem:[%s4795_s7] ss:$0 sm:$0xff]  ;;  %s3958_s7 = smov 32  }
  0x28   :  { %3233 = vmatmul.mubr.msk.f32.vlgmr.msra.gmra.mrb[0].mxu1 %vm226_vm7, %v205_v47  ;;  %3226 = vmatmul.mubr.msk.f32.vlgmr.msra.gmra.mrb[0].mxu0 %vm226_vm7, %v205_v47 }
  0x29   :  { %3579 = vmatpush3.bf16.msra.mxu1 %v4146_v40  ;;  %3573 = vmatpush3.bf16.msra.mxu0 %v4148_v41 }
  0x2a   :  { %3580 = vmatprep.subr.bf16.mxu1 %v3954_v7  ;;  %3574 = vmatprep.subr.bf16.mxu0 %v3954_v7 }
  0x2b   :  { %3254 = vmatprep.mubr.msk.f32.mxu1 %vm3955_vm8, %v3956_v50  ;;  %3243 = vmatprep.mubr.msk.f32.mxu0 %vm3955_vm8, %v3956_v50 }
  0x2d   :  { %3582 = vmatpush3.bf16.msra.mxu1 %v4168_v48  ;;  %3576 = vmatpush3.bf16.msra.mxu0 %v4170_v49 }
  0x2e   :  { %3589 = vmatprep.subr.bf16.mxu1 %v3954_v7  ;;  %3583 = vmatprep.subr.bf16.mxu0 %v3954_v7 }
  0x30   :  { %3255 = vmatmul.mubr.f32.vlgmr.msra.gmra.mrb[2].mxu1 %v3956_v50  ;;  %3244 = vmatmul.mubr.f32.vlgmr.msra.gmra.mrb[2].mxu0 %v3956_v50 }
  0x31   :  { %3591 = vmatpush3.bf16.msra.mxu1 %v4146_v40  ;;  %3585 = vmatpush3.bf16.msra.mxu0 %v4148_v41 }
  0x32   :  { %3592 = vmatprep.subr.bf16.mxu1 %v3954_v7  ;;  %3586 = vmatprep.subr.bf16.mxu0 %v3954_v7 }
  0x33   :  { %3276 = vmatprep.mubr.msk.f32.mxu1 %vm3955_vm8, %v3956_v50  ;;  %3265 = vmatprep.mubr.msk.f32.mxu0 %vm3955_vm8, %v3956_v50 }
  0x35   :  { %3594 = vmatpush3.bf16.msra.mxu1 %v4168_v48  ;;  %3588 = vmatpush3.bf16.msra.mxu0 %v4170_v49 }
  0x36   :  { %3601 = vmatprep.subr.bf16.mxu1 %v3954_v7  ;;  %3595 = vmatprep.subr.bf16.mxu0 %v3954_v7 }
  0xfb   :  { %v3234_v53 = vpop.f32.mrb[0].mxu1  ;;  %v3227_v54 = vpop.f32.mrb[0].mxu0 }
  0xfc   :  { %v380_v55 = vpop.f32.mrb[1].mxu1  ;;  %v4202_v56 = vadd.f32 %v3227_v54, %v2959_v51  ;;  %v299_v57 = vpop.f32.mrb[1].mxu0  ;;  %v4206_v61 = vadd.f32 %v3234_v53, %v2962_v52 }
  0xfd   :  { %v4204_v58 = vadd.f32 %v2962_v52, %v380_v55  ;;  %v4208_v62 = vadd.f32 %v2959_v51, %v299_v57 }
 0x103   :  { %v554_v59 = vpop.f32.mrb[2].mxu1  ;;  %v459_v60 = vpop.f32.mrb[2].mxu0 }
 0x104   :  { %v559_v63 = vrot.slane %v554_v59, 2  ;;  %v3256_v0 = vpop.f32.mrb[3].mxu1  ;;  %v3245_v1 = vpop.f32.mrb[3].mxu0  ;;  %v463_v3 = vadd.f32 %v459_v60, %v4208_v62 }
 0x106   :  { %v561_v2 = vadd.f32 %v559_v63, %v4206_v61  ;;  %v2965_v8 = vmul.f32 -1.442695, %v463_v3 }
 0x108   :  { %3807 = vtanh.f32 %v561_v2  ;;  %v2966_v6 = vmul.f32 -1.442695, %v561_v2 }
 0x109   :  { %3809 = vtanh.f32 %v463_v3 }
 0x10a   :  { %3811 = vpow2.f32 %v2966_v6 }
 0x10b   :  { %3813 = vpow2.f32 %v2965_v8 }
 0x112   :  { %v3808_v4 = vpop.eup %3807 }
 0x113   :  { %571 = vrot.lane.b32.xlu0 %v3808_v4, %s3957_s4  ;;  %v3810_v5 = vpop.eup %3809 }
 0x114   :  { %v3812_v9 = vpop.eup %3811 }
 0x115   :  { %v565_v10 = vadd.f32 1.0, %v3812_v9  ;;  %v3814_v11 = vpop.eup %3813 }
 0x116   :  { %v467_v12 = vadd.f32 1.0, %v3814_v11 }
 0x117   :  { %473 = vrot.lane.b32.xlu0 %v3810_v5, %s3957_s4  ;;  %3815 = vrcp.f32 %v565_v10 }
 0x118   :  { %3817 = vrcp.f32 %v467_v12 }
 0x121   :  { %v3816_v13 = vpop.eup %3815 }
 0x122   :  { %v3818_v16 = vpop.eup %3817  ;;  %v569_v19 = vmul.f32 0.0, %v3816_v13 }
 0x123   :  { %v471_v22 = vmul.f32 0.0, %v3818_v16 }
 0x185   :  { %v572_v14 = vpop.permute.xlu0 %571 }
 0x186   :  { %v574_v15 = vmul.f32 %v3816_v13, %v572_v14 }
 0x188   :  { %576 = vrot.lane.b32.xlu1 %v574_v15, %s3958_s7 }
 0x189   :  { %v474_v17 = vpop.permute.xlu0 %473 }
 0x18a   :  { %v476_v18 = vmul.f32 %v3818_v16, %v474_v17 }
 0x18c   :  { %478 = vrot.lane.b32.xlu1 %v476_v18, %s3958_s7 }
 0x1fa   :  { %v577_v20 = vpop.permute.xlu1 %576 }
 0x1fb   :  { %v4216_v21 = vadd.f32 %v577_v20, %v569_v19 }
 0x1fd   :  { %3819 = vtanh.f32 %v4216_v21  ;;  %v780_v1 = vrot.slane %v4216_v21, 2 }
 0x1fe   :  { %v479_v23 = vpop.permute.xlu1 %478 }
 0x1ff   :  { %v4219_v24 = vadd.f32 %v479_v23, %v471_v22 }
 0x201   :  { %3821 = vtanh.f32 %v4219_v24  ;;  %v673_v3 = vrot.slane %v4219_v24, 6 }
 0x207   :  { %v3820_v25 = vpop.eup %3819 }
 0x208   :  { %582 = vrot.lane.b32.xlu0 %v3820_v25, %s3957_s4 }
 0x20b   :  { %v3822_v26 = vpop.eup %3821 }
 0x20c   :  { %484 = vrot.lane.b32.xlu1 %v3822_v26, %s3957_s4 }
 0x27a   :  { %v583_v27 = vpop.permute.xlu0 %582 }
 0x27b   :  { %v4224_v28 = vmul.f32 %v3816_v13, %v583_v27 }
 0x27d   :  { %v693_v29 = vrot.slane %v4224_v28, 6 }
 0x27e   :  { %v485_v30 = vpop.permute.xlu1 %484 }
 0x27f   :  { %v4227_v31 = vmul.f32 %v3818_v16, %v485_v30  ;;  %694 = vrot.lane.b32.xlu1 %v693_v29, %s3958_s7 }
 0x281   :  { %587 = vrot.lane.b32.xlu0 %v4227_v31, %s3958_s7 }
 0x2f1   :  { %v695_v32 = vpop.permute.xlu1 %694 }
 0x2f2   :  { %3277 = vmatmul.mubr.msk.f32.vlgmr.msra.gmra.mrb[4].mxu1 %vm389_vm9, %v695_v32 }
 0x2f3   :  { %v588_v33 = vpop.permute.xlu0 %587  ;;  %3603 = vmatpush3.bf16.msra.mxu1 %v4146_v40  ;;  %3298 = vmatprep.mubr.msk.f32.mxu1 %vm3955_vm8, %v3956_v50 }
 0x2f4   :  { %3266 = vmatmul.mubr.msk.f32.vlgmr.msra.gmra.mrb[4].mxu0 %vm389_vm9, %v588_v33  ;;  %3604 = vmatprep.subr.bf16.mxu1 %v3954_v7 }
 0x2f5   :  { %3597 = vmatpush3.bf16.msra.mxu0 %v4148_v41  ;;  %3287 = vmatprep.mubr.msk.f32.mxu0 %vm3955_vm8, %v3956_v50 }
 0x2f6   :  { %3598 = vmatprep.subr.bf16.mxu0 %v3954_v7 }
 0x2f7   :  { %3606 = vmatpush3.bf16.msra.mxu1 %v4168_v48 }
 0x2f8   :  { %3613 = vmatprep.subr.bf16.mxu1 %v3954_v7 }
 0x2f9   :  { %3600 = vmatpush3.bf16.msra.mxu0 %v4170_v49 }
 0x2fa   :  { %3607 = vmatprep.subr.bf16.mxu0 %v3954_v7 }
 0x3c5   :  { %v764_v34 = vpop.f32.mrb[4].mxu1 }
 0x3c6   :  { %v769_v35 = vrot.slane %v764_v34, 4  ;;  %v3278_v36 = vpop.f32.mrb[5].mxu1 }
 0x3c7   :  { %v657_v37 = vpop.f32.mrb[4].mxu0 }
 0x3c8   :  { %v771_v38 = vadd.f32 %v769_v35, %v4206_v61  ;;  %v662_v39 = vrot.slane %v657_v37, 6  ;;  %v3267_v42 = vpop.f32.mrb[5].mxu0 }
 0x3ca   :  { %3823 = vtanh.f32 %v771_v38  ;;  %v664_v43 = vadd.f32 %v662_v39, %v4208_v62  ;;  %v2970_v46 = vmul.f32 -1.442695, %v771_v38 }
 0x3cc   :  { %3825 = vtanh.f32 %v664_v43  ;;  %v2968_v47 = vmul.f32 -1.442695, %v664_v43 }
 0x3cd   :  { %3827 = vpow2.f32 %v2970_v46 }
 0x3ce   :  { %3829 = vpow2.f32 %v2968_v47 }
 0x3d4   :  { %v3824_v44 = vpop.eup %3823 }
 0x3d5   :  { %784 = vrot.lane.b32.xlu1 %v3824_v44, %s3957_s4 }
 0x3d6   :  { %v3826_v45 = vpop.eup %3825 }
 0x3d7   :  { %677 = vrot.lane.b32.xlu0 %v3826_v45, %s3957_s4  ;;  %v3828_v51 = vpop.eup %3827 }
 0x3d8   :  { %v3830_v52 = vpop.eup %3829  ;;  %v775_v53 = vadd.f32 1.0, %v3828_v51 }
 0x3d9   :  { %v668_v54 = vadd.f32 1.0, %v3830_v52 }
 0x3da   :  { %3831 = vrcp.f32 %v775_v53 }
 0x3db   :  { %3833 = vrcp.f32 %v668_v54 }
 0x3e4   :  { %v3832_v55 = vpop.eup %3831 }
 0x3e5   :  { %v3834_v60 = vpop.eup %3833  ;;  %v782_v2 = vmul.f32 %v3832_v55, %v780_v1 }
 0x3e6   :  { %v675_v6 = vmul.f32 %v3834_v60, %v673_v3 }
 0x447   :  { %v785_v57 = vpop.permute.xlu1 %784 }
 0x448   :  { %v787_v59 = vmul.f32 %v3832_v55, %v785_v57 }
 0x449   :  { %v678_v63 = vpop.permute.xlu0 %677 }
 0x44a   :  { %789 = vrot.lane.b32.xlu1 %v787_v59, %s3958_s7  ;;  %v680_v0 = vmul.f32 %v3834_v60, %v678_v63 }
 0x44c   :  { %682 = vrot.lane.b32.xlu0 %v680_v0, %s3958_s7 }
 0x4bc   :  { %v790_v4 = vpop.permute.xlu1 %789 }
 0x4bd   :  { %v4256_v5 = vadd.f32 %v790_v4, %v782_v2 }
 0x4be   :  { %v683_v8 = vpop.permute.xlu0 %682 }
 0x4bf   :  { %3835 = vtanh.f32 %v4256_v5  ;;  %v4259_v9 = vadd.f32 %v683_v8, %v675_v6  ;;  %v994_v47 = vrot.slane %v4256_v5, 2 }
 0x4c1   :  { %3837 = vtanh.f32 %v4259_v9  ;;  %v887_v52 = vrot.slane %v4259_v9, 6 }
 0x4c9   :  { %v3836_v10 = vpop.eup %3835 }
 0x4ca   :  { %795 = vrot.lane.b32.xlu1 %v3836_v10, %s3957_s4 }
 0x4cb   :  { %v3838_v11 = vpop.eup %3837 }
 0x4cc   :  { %688 = vrot.lane.b32.xlu0 %v3838_v11, %s3957_s4 }
 0x53c   :  { %v796_v12 = vpop.permute.xlu1 %795 }
 0x53d   :  { %v4264_v13 = vmul.f32 %v3832_v55, %v796_v12 }
 0x53e   :  { %v689_v15 = vpop.permute.xlu0 %688 }
 0x53f   :  { %v907_v14 = vrot.slane %v4264_v13, 4  ;;  %v4267_v16 = vmul.f32 %v3834_v60, %v689_v15 }
 0x541   :  { %908 = vrot.lane.b32.xlu1 %v907_v14, %s3958_s7  ;;  %v800_v17 = vrot.slane %v4267_v16, 2  ;;  %v2110_v5 = vsel %vm187_vm1, %v4227_v31, %v4267_v16 }
 0x543   :  { %801 = vrot.lane.b32.xlu0 %v800_v17, %s3958_s7  ;;  %v2073_v6 = vadd.f32 %v800_v17, %v4227_v31 }
 0x5b3   :  { %v909_v18 = vpop.permute.xlu1 %908 }
 0x5b4   :  { %3299 = vmatmul.mubr.msk.f32.vlgmr.msra.gmra.mrb[6].mxu1 %vm389_vm9, %v909_v18 }
 0x5b5   :  { %3615 = vmatpush3.bf16.msra.mxu1 %v4146_v40  ;;  %3320 = vmatprep.mubr.msk.f32.mxu1 %vm3955_vm8, %v3956_v50  ;;  %v802_v19 = vpop.permute.xlu0 %801 }
 0x5b6   :  { %3616 = vmatprep.subr.bf16.mxu1 %v3954_v7  ;;  %3288 = vmatmul.mubr.msk.f32.vlgmr.msra.gmra.mrb[6].mxu0 %vm389_vm9, %v802_v19 }
 0x5b7   :  { %3609 = vmatpush3.bf16.msra.mxu0 %v4148_v41  ;;  %3309 = vmatprep.mubr.msk.f32.mxu0 %vm3955_vm8, %v3956_v50 }
 0x5b8   :  { %3610 = vmatprep.subr.bf16.mxu0 %v3954_v7 }
 0x5b9   :  { %3618 = vmatpush3.bf16.msra.mxu1 %v4168_v48 }
 0x5ba   :  { %3625 = vmatprep.subr.bf16.mxu1 %v3954_v7 }
 0x5bb   :  { %3612 = vmatpush3.bf16.msra.mxu0 %v4170_v49 }
 0x5bc   :  { %3619 = vmatprep.subr.bf16.mxu0 %v3954_v7 }
 0x687   :  { %v978_v20 = vpop.f32.mrb[6].mxu1 }
 0x688   :  { %v983_v21 = vrot.slane %v978_v20, 6  ;;  %v3300_v22 = vpop.f32.mrb[7].mxu1 }
 0x689   :  { %v871_v24 = vpop.f32.mrb[6].mxu0 }
 0x68a   :  { %v985_v23 = vadd.f32 %v983_v21, %v4206_v61  ;;  %v876_v25 = vrot.slane %v871_v24, 4  ;;  %v3289_v26 = vpop.f32.mrb[7].mxu0 }
 0x68c   :  { %3839 = vtanh.f32 %v985_v23  ;;  %v878_v27 = vadd.f32 %v876_v25, %v4208_v62  ;;  %v2974_v33 = vmul.f32 -1.442695, %v985_v23 }
 0x68e   :  { %3841 = vtanh.f32 %v878_v27  ;;  %v2972_v34 = vmul.f32 -1.442695, %v878_v27 }
 0x68f   :  { %3843 = vpow2.f32 %v2974_v33 }
 0x690   :  { %3845 = vpow2.f32 %v2972_v34 }
 0x696   :  { %v3840_v30 = vpop.eup %3839 }
 0x697   :  { %998 = vrot.lane.b32.xlu1 %v3840_v30, %s3957_s4 }
 0x698   :  { %v3842_v32 = vpop.eup %3841 }
 0x699   :  { %891 = vrot.lane.b32.xlu0 %v3842_v32, %s3957_s4  ;;  %v3844_v35 = vpop.eup %3843 }
 0x69a   :  { %v3846_v36 = vpop.eup %3845  ;;  %v989_v37 = vadd.f32 1.0, %v3844_v35 }
 0x69b   :  { %v882_v38 = vadd.f32 1.0, %v3846_v36 }
 0x69c   :  { %3847 = vrcp.f32 %v989_v37 }
 0x69d   :  { %3849 = vrcp.f32 %v882_v38 }
 0x6a6   :  { %v3848_v39 = vpop.eup %3847 }
 0x6a7   :  { %v3850_v44 = vpop.eup %3849  ;;  %v996_v51 = vmul.f32 %v3848_v39, %v994_v47 }
 0x6a8   :  { %v889_v55 = vmul.f32 %v3850_v44, %v887_v52 }
 0x709   :  { %v999_v42 = vpop.permute.xlu1 %998 }
 0x70a   :  { %v1001_v43 = vmul.f32 %v3848_v39, %v999_v42 }
 0x70b   :  { %v892_v45 = vpop.permute.xlu0 %891 }
 0x70c   :  { %1003 = vrot.lane.b32.xlu1 %v1001_v43, %s3958_s7  ;;  %v894_v46 = vmul.f32 %v3850_v44, %v892_v45 }
 0x70e   :  { %896 = vrot.lane.b32.xlu0 %v894_v46, %s3958_s7 }
 0x77e   :  { %v1004_v53 = vpop.permute.xlu1 %1003 }
 0x77f   :  { %v4298_v54 = vadd.f32 %v1004_v53, %v996_v51 }
 0x780   :  { %v897_v57 = vpop.permute.xlu0 %896 }
 0x781   :  { %3851 = vtanh.f32 %v4298_v54  ;;  %v4301_v59 = vadd.f32 %v897_v57, %v889_v55  ;;  %v1205_v36 = vrot.slane %v4298_v54, 2 }
 0x783   :  { %3853 = vtanh.f32 %v4301_v59  ;;  %v1101_v42 = vrot.slane %v4301_v59, 6 }
 0x78b   :  { %v3852_v60 = vpop.eup %3851 }
 0x78c   :  { %1009 = vrot.lane.b32.xlu1 %v3852_v60, %s3957_s4 }
 0x78d   :  { %v3854_v63 = vpop.eup %3853 }
 0x78e   :  { %902 = vrot.lane.b32.xlu0 %v3854_v63, %s3957_s4 }
 0x7fe   :  { %v1010_v0 = vpop.permute.xlu1 %1009 }
 0x7ff   :  { %v4306_v1 = vmul.f32 %v3848_v39, %v1010_v0 }
 0x800   :  { %v903_v3 = vpop.permute.xlu0 %902 }
 0x801   :  { %v1121_v2 = vrot.slane %v4306_v1, 2  ;;  %v905_v4 = vmul.f32 %v3850_v44, %v903_v3 }
 0x803   :  { %1122 = vrot.lane.b32.xlu1 %v1121_v2, %s3958_s7  ;;  %v1014_v8 = vrot.slane %v905_v4, 4  ;;  %v4319_v9 = vsel %vm191_vm3, %v2110_v5, %v905_v4 }
 0x805   :  { %v4321_v10 = vadd.f32 %v2073_v6, %v1014_v8  ;;  %1015 = vrot.lane.b32.xlu0 %v1014_v8, %s3958_s7 }
 0x875   :  { %v1123_v11 = vpop.permute.xlu1 %1122 }
 0x876   :  { %3321 = vmatmul.mubr.msk.f32.vlgmr.msra.gmra.mrb[8].mxu1 %vm389_vm9, %v1123_v11 }
 0x877   :  { %3627 = vmatpush3.bf16.msra.mxu1 %v4146_v40  ;;  %3342 = vmatprep.mubr.msk.f32.mxu1 %vm3955_vm8, %v3956_v50  ;;  %v1016_v12 = vpop.permute.xlu0 %1015 }
 0x878   :  { %3628 = vmatprep.subr.bf16.mxu1 %v3954_v7  ;;  %3310 = vmatmul.mubr.msk.f32.vlgmr.msra.gmra.mrb[8].mxu0 %vm389_vm9, %v1016_v12 }
 0x879   :  { %3621 = vmatpush3.bf16.msra.mxu0 %v4148_v41  ;;  %3331 = vmatprep.mubr.msk.f32.mxu0 %vm3955_vm8, %v3956_v50 }
 0x87a   :  { %3622 = vmatprep.subr.bf16.mxu0 %v3954_v7 }
 0x87b   :  { %3630 = vmatpush3.bf16.msra.mxu1 %v4168_v48 }
 0x87c   :  { %3637 = vmatprep.subr.bf16.mxu1 %v3954_v7 }
 0x87d   :  { %3624 = vmatpush3.bf16.msra.mxu0 %v4170_v49 }
 0x87e   :  { %3631 = vmatprep.subr.bf16.mxu0 %v3954_v7 }
 0x949   :  { %v1192_v31 = vpop.f32.mrb[8].mxu1 }
 0x94a   :  { %v1196_v15 = vadd.f32 %v1192_v31, %v4206_v61  ;;  %v3322_v16 = vpop.f32.mrb[9].mxu1 }
 0x94b   :  { %v1085_v17 = vpop.f32.mrb[8].mxu0 }
 0x94c   :  { %3855 = vtanh.f32 %v1196_v15  ;;  %v1090_v18 = vrot.slane %v1085_v17, 2  ;;  %v3311_v19 = vpop.f32.mrb[9].mxu0  ;;  %v2978_v23 = vmul.f32 -1.442695, %v1196_v15 }
 0x94e   :  { %v1092_v20 = vadd.f32 %v1090_v18, %v4208_v62 }
 0x950   :  { %3857 = vtanh.f32 %v1092_v20  ;;  %v2976_v24 = vmul.f32 -1.442695, %v1092_v20 }
 0x951   :  { %3859 = vpow2.f32 %v2978_v23 }
 0x952   :  { %3861 = vpow2.f32 %v2976_v24 }
 0x956   :  { %v3856_v21 = vpop.eup %3855 }
 0x957   :  { %1209 = vrot.lane.b32.xlu0 %v3856_v21, %s3957_s4 }
 0x95a   :  { %v3858_v22 = vpop.eup %3857 }
 0x95b   :  { %1105 = vrot.lane.b32.xlu1 %v3858_v22, %s3957_s4  ;;  %v3860_v25 = vpop.eup %3859 }
 0x95c   :  { %v1200_v61 = vadd.f32 1.0, %v3860_v25  ;;  %v3862_v26 = vpop.eup %3861 }
 0x95d   :  { %v1096_v27 = vadd.f32 1.0, %v3862_v26 }
 0x95e   :  { %3863 = vrcp.f32 %v1200_v61 }
 0x95f   :  { %3865 = vrcp.f32 %v1096_v27 }
 0x968   :  { %v3864_v30 = vpop.eup %3863 }
 0x969   :  { %v3866_v33 = vpop.eup %3865  ;;  %v1207_v37 = vmul.f32 %v3864_v30, %v1205_v36 }
 0x96a   :  { %v1103_v43 = vmul.f32 %v3866_v33, %v1101_v42 }
 0x9c9   :  { %v1210_v32 = vpop.permute.xlu0 %1209 }
 0x9ca   :  { %v1212_v62 = vmul.f32 %v3864_v30, %v1210_v32 }
 0x9cc   :  { %1214 = vrot.lane.b32.xlu0 %v1212_v62, %s3958_s7 }
 0x9cd   :  { %v1106_v34 = vpop.permute.xlu1 %1105 }
 0x9ce   :  { %v1108_v35 = vmul.f32 %v3866_v33, %v1106_v34 }
 0x9d0   :  { %1110 = vrot.lane.b32.xlu1 %v1108_v35, %s3958_s7 }
 0xa3e   :  { %v1215_v38 = vpop.permute.xlu0 %1214 }
 0xa3f   :  { %v4345_v39 = vadd.f32 %v1215_v38, %v1207_v37 }
 0xa41   :  { %3867 = vtanh.f32 %v4345_v39  ;;  %v1415_v25 = vrot.slane %v4345_v39, 2 }
 0xa42   :  { %v1111_v44 = vpop.permute.xlu1 %1110 }
 0xa43   :  { %v4349_v45 = vadd.f32 %v1111_v44, %v1103_v43 }
 0xa45   :  { %3869 = vtanh.f32 %v4349_v45 }
 0xa4b   :  { %v3868_v46 = vpop.eup %3867 }
 0xa4c   :  { %1220 = vrot.lane.b32.xlu0 %v3868_v46, %s3957_s4 }
 0xa4f   :  { %v3870_v47 = vpop.eup %3869 }
 0xa50   :  { %1116 = vrot.lane.b32.xlu1 %v3870_v47, %s3957_s4 }
 0xabe   :  { %v1221_v51 = vpop.permute.xlu0 %1220 }
 0xabf   :  { %v4354_v52 = vmul.f32 %v3864_v30, %v1221_v51  ;;  %v1309_v30 = vrot.slane %v4349_v45, 6 }
 0xac1   :  { %1329 = vrot.lane.b32.xlu0 %v4354_v52, %s3958_s7 }
 0xac2   :  { %v1117_v53 = vpop.permute.xlu1 %1116 }
 0xac3   :  { %v1119_v54 = vmul.f32 %v3866_v33, %v1117_v53 }
 0xac5   :  { %v1225_v55 = vrot.slane %v1119_v54, 6  ;;  %v4360_v57 = vsel %vm195_vm5, %v4319_v9, %v1119_v54 }
 0xac7   :  { %v4363_v59 = vadd.f32 %v4321_v10, %v1225_v55  ;;  %1226 = vrot.lane.b32.xlu1 %v1225_v55, %s3958_s7 }
 0xb33   :  { %v1330_v60 = vpop.permute.xlu0 %1329 }
 0xb34   :  { %3343 = vmatmul.mubr.msk.f32.vlgmr.msra.gmra.mrb[10].mxu1 %vm389_vm9, %v1330_v60 }
 0xb35   :  { %3639 = vmatpush3.bf16.msra.mxu1 %v4146_v40  ;;  %3364 = vmatprep.mubr.msk.f32.mxu1 %vm3955_vm8, %v3956_v50 }
 0xb36   :  { %3640 = vmatprep.subr.bf16.mxu1 %v3954_v7 }
 0xb39   :  { %3642 = vmatpush3.bf16.msra.mxu1 %v4168_v48  ;;  %v1227_v63 = vpop.permute.xlu1 %1226 }
 0xb3a   :  { %3649 = vmatprep.subr.bf16.mxu1 %v3954_v7  ;;  %3332 = vmatmul.mubr.msk.f32.vlgmr.msra.gmra.mrb[10].mxu0 %vm389_vm9, %v1227_v63 }
 0xb3b   :  { %3633 = vmatpush3.bf16.msra.mxu0 %v4148_v41  ;;  %3353 = vmatprep.mubr.msk.f32.mxu0 %vm3955_vm8, %v3956_v50 }
 0xb3c   :  { %3634 = vmatprep.subr.bf16.mxu0 %v3954_v7 }
 0xb3f   :  { %3636 = vmatpush3.bf16.msra.mxu0 %v4170_v49 }
 0xb40   :  { %3643 = vmatprep.subr.bf16.mxu0 %v3954_v7 }
 0xc07   :  { %v1399_v0 = vpop.f32.mrb[10].mxu1 }
 0xc08   :  { %v1404_v3 = vrot.slane %v1399_v0, 2  ;;  %v3344_v4 = vpop.f32.mrb[11].mxu1 }
 0xc0a   :  { %v1406_v5 = vadd.f32 %v1404_v3, %v4204_v58 }
 0xc0c   :  { %3871 = vtanh.f32 %v1406_v5  ;;  %v2982_v12 = vmul.f32 -1.442695, %v1406_v5 }
 0xc0d   :  { %v1296_v6 = vpop.f32.mrb[10].mxu0 }
 0xc0e   :  { %v1300_v8 = vadd.f32 %v1296_v6, %v4202_v56  ;;  %v3333_v9 = vpop.f32.mrb[11].mxu0 }
 0xc10   :  { %3873 = vtanh.f32 %v1300_v8  ;;  %v2980_v31 = vmul.f32 -1.442695, %v1300_v8 }
 0xc11   :  { %3875 = vpow2.f32 %v2982_v12 }
 0xc12   :  { %3877 = vpow2.f32 %v2980_v31 }
 0xc16   :  { %v3872_v10 = vpop.eup %3871 }
 0xc17   :  { %1419 = vrot.lane.b32.xlu0 %v3872_v10, %s3957_s4 }
 0xc1a   :  { %v3874_v11 = vpop.eup %3873 }
 0xc1b   :  { %1313 = vrot.lane.b32.xlu1 %v3874_v11, %s3957_s4  ;;  %v3876_v15 = vpop.eup %3875 }
 0xc1c   :  { %v1410_v16 = vadd.f32 1.0, %v3876_v15  ;;  %v3878_v17 = vpop.eup %3877 }
 0xc1d   :  { %v1304_v18 = vadd.f32 1.0, %v3878_v17 }
 0xc1e   :  { %3879 = vrcp.f32 %v1410_v16 }
 0xc1f   :  { %3881 = vrcp.f32 %v1304_v18 }
 0xc28   :  { %v3880_v19 = vpop.eup %3879 }
 0xc29   :  { %v3882_v22 = vpop.eup %3881  ;;  %v1417_v61 = vmul.f32 %v3880_v19, %v1415_v25 }
 0xc2a   :  { %v1311_v32 = vmul.f32 %v3882_v22, %v1309_v30 }
 0xc89   :  { %v1420_v20 = vpop.permute.xlu0 %1419 }
 0xc8a   :  { %v1422_v21 = vmul.f32 %v3880_v19, %v1420_v20 }
 0xc8c   :  { %1424 = vrot.lane.b32.xlu0 %v1422_v21, %s3958_s7 }
 0xc8d   :  { %v1314_v23 = vpop.permute.xlu1 %1313 }
 0xc8e   :  { %v1316_v24 = vmul.f32 %v3882_v22, %v1314_v23 }
 0xc90   :  { %1318 = vrot.lane.b32.xlu1 %v1316_v24, %s3958_s7 }
 0xcfe   :  { %v1425_v26 = vpop.permute.xlu0 %1424 }
 0xcff   :  { %v4387_v27 = vadd.f32 %v1425_v26, %v1417_v61 }
 0xd01   :  { %3883 = vtanh.f32 %v4387_v27  ;;  %v1628_v17 = vrot.slane %v4387_v27, 2 }
 0xd02   :  { %v1319_v62 = vpop.permute.xlu1 %1318 }
 0xd03   :  { %v4391_v33 = vadd.f32 %v1319_v62, %v1311_v32 }
 0xd05   :  { %3885 = vtanh.f32 %v4391_v33 }
 0xd0b   :  { %v3884_v34 = vpop.eup %3883 }
 0xd0c   :  { %1430 = vrot.lane.b32.xlu0 %v3884_v34, %s3957_s4 }
 0xd0f   :  { %v3886_v35 = vpop.eup %3885 }
 0xd10   :  { %1324 = vrot.lane.b32.xlu1 %v3886_v35, %s3957_s4 }
 0xd7e   :  { %v1431_v36 = vpop.permute.xlu0 %1430 }
 0xd7f   :  { %v4396_v37 = vmul.f32 %v3880_v19, %v1431_v36  ;;  %v1521_v19 = vrot.slane %v4391_v33, 6 }
 0xd81   :  { %v1541_v38 = vrot.slane %v4396_v37, 6 }
 0xd82   :  { %v1325_v39 = vpop.permute.xlu1 %1324 }
 0xd83   :  { %1542 = vrot.lane.b32.xlu1 %v1541_v38, %s3958_s7  ;;  %v4402_v42 = vmul.f32 %v3882_v22, %v1325_v39 }
 0xd85   :  { %1435 = vrot.lane.b32.xlu0 %v4402_v42, %s3958_s7  ;;  %v2084_v33 = vadd.f32 %v4363_v59, %v4402_v42 }
 0xdf5   :  { %v1543_v43 = vpop.permute.xlu1 %1542 }
 0xdf6   :  { %3365 = vmatmul.mubr.msk.f32.vlgmr.msra.gmra.mrb[12].mxu1 %vm389_vm9, %v1543_v43 }
 0xdf7   :  { %3651 = vmatpush3.bf16.msra.mxu1 %v4146_v40  ;;  %3386 = vmatprep.mubr.msk.f32.mxu1 %vm3955_vm8, %v3956_v50  ;;  %v1436_v44 = vpop.permute.xlu0 %1435 }
 0xdf8   :  { %3652 = vmatprep.subr.bf16.mxu1 %v3954_v7  ;;  %3354 = vmatmul.mubr.msk.f32.vlgmr.msra.gmra.mrb[12].mxu0 %vm389_vm9, %v1436_v44 }
 0xdf9   :  { %3645 = vmatpush3.bf16.msra.mxu0 %v4148_v41  ;;  %3375 = vmatprep.mubr.msk.f32.mxu0 %vm3955_vm8, %v3956_v50 }
 0xdfa   :  { %3646 = vmatprep.subr.bf16.mxu0 %v3954_v7 }
 0xdfb   :  { %3654 = vmatpush3.bf16.msra.mxu1 %v4168_v48 }
 0xdfc   :  { %3661 = vmatprep.subr.bf16.mxu1 %v3954_v7 }
 0xdfd   :  { %3648 = vmatpush3.bf16.msra.mxu0 %v4170_v49 }
 0xdfe   :  { %3655 = vmatprep.subr.bf16.mxu0 %v3954_v7 }
 0xec9   :  { %v1612_v45 = vpop.f32.mrb[12].mxu1 }
 0xeca   :  { %v1617_v46 = vrot.slane %v1612_v45, 4  ;;  %v3366_v47 = vpop.f32.mrb[13].mxu1 }
 0xecb   :  { %v1505_v53 = vpop.f32.mrb[12].mxu0 }
 0xecc   :  { %v1619_v51 = vadd.f32 %v1617_v46, %v4204_v58  ;;  %v1510_v54 = vrot.slane %v1505_v53, 6  ;;  %v3355_v55 = vpop.f32.mrb[13].mxu0 }
 0xece   :  { %3887 = vtanh.f32 %v1619_v51  ;;  %v1512_v60 = vadd.f32 %v1510_v54, %v4202_v56  ;;  %v2986_v3 = vmul.f32 -1.442695, %v1619_v51 }
 0xed0   :  { %3889 = vtanh.f32 %v1512_v60  ;;  %v2984_v4 = vmul.f32 -1.442695, %v1512_v60 }
 0xed1   :  { %3891 = vpow2.f32 %v2986_v3 }
 0xed2   :  { %3893 = vpow2.f32 %v2984_v4 }
 0xed8   :  { %v3888_v63 = vpop.eup %3887 }
 0xed9   :  { %1632 = vrot.lane.b32.xlu1 %v3888_v63, %s3957_s4 }
 0xeda   :  { %v3890_v0 = vpop.eup %3889 }
 0xedb   :  { %1525 = vrot.lane.b32.xlu0 %v3890_v0, %s3957_s4  ;;  %v3892_v5 = vpop.eup %3891 }
 0xedc   :  { %v3894_v6 = vpop.eup %3893  ;;  %v1623_v8 = vadd.f32 1.0, %v3892_v5 }
 0xedd   :  { %v1516_v9 = vadd.f32 1.0, %v3894_v6 }
 0xede   :  { %3895 = vrcp.f32 %v1623_v8 }
 0xedf   :  { %3897 = vrcp.f32 %v1516_v9 }
 0xee8   :  { %v3896_v10 = vpop.eup %3895 }
 0xee9   :  { %v3898_v31 = vpop.eup %3897  ;;  %v1630_v18 = vmul.f32 %v3896_v10, %v1628_v17 }
 0xeea   :  { %v1523_v22 = vmul.f32 %v3898_v31, %v1521_v19 }
 0xf4b   :  { %v1633_v11 = vpop.permute.xlu1 %1632 }
 0xf4c   :  { %v1635_v12 = vmul.f32 %v3896_v10, %v1633_v11 }
 0xf4d   :  { %v1526_v15 = vpop.permute.xlu0 %1525 }
 0xf4e   :  { %1637 = vrot.lane.b32.xlu1 %v1635_v12, %s3958_s7  ;;  %v1528_v16 = vmul.f32 %v3898_v31, %v1526_v15 }
 0xf50   :  { %1530 = vrot.lane.b32.xlu0 %v1528_v16, %s3958_s7 }
 0xfc0   :  { %v1638_v20 = vpop.permute.xlu1 %1637 }
 0xfc1   :  { %v4428_v21 = vadd.f32 %v1638_v20, %v1630_v18 }
 0xfc2   :  { %v1531_v23 = vpop.permute.xlu0 %1530 }
 0xfc3   :  { %3899 = vtanh.f32 %v4428_v21  ;;  %v4431_v24 = vadd.f32 %v1531_v23, %v1523_v22  ;;  %v1842_v9 = vrot.slane %v4428_v21, 2 }
 0xfc5   :  { %3901 = vtanh.f32 %v4431_v24  ;;  %v1735_v11 = vrot.slane %v4431_v24, 6 }
 0xfcd   :  { %v3900_v25 = vpop.eup %3899 }
 0xfce   :  { %1643 = vrot.lane.b32.xlu1 %v3900_v25, %s3957_s4 }
 0xfcf   :  { %v3902_v61 = vpop.eup %3901 }
 0xfd0   :  { %1536 = vrot.lane.b32.xlu0 %v3902_v61, %s3957_s4 }
0x1040   :  { %v1644_v26 = vpop.permute.xlu1 %1643 }
0x1041   :  { %v4436_v27 = vmul.f32 %v3896_v10, %v1644_v26 }
0x1042   :  { %v1537_v32 = vpop.permute.xlu0 %1536 }
0x1043   :  { %v1755_v30 = vrot.slane %v4436_v27, 4  ;;  %v4439_v62 = vmul.f32 %v3898_v31, %v1537_v32 }
0x1045   :  { %1756 = vrot.lane.b32.xlu1 %v1755_v30, %s3958_s7  ;;  %v1648_v34 = vrot.slane %v4439_v62, 2  ;;  %v2113_v25 = vsel %vm187_vm1, %v4402_v42, %v4439_v62 }
0x1047   :  { %v4447_v35 = vadd.f32 %v2084_v33, %v1648_v34  ;;  %1649 = vrot.lane.b32.xlu0 %v1648_v34, %s3958_s7 }
0x10b7   :  { %v1757_v36 = vpop.permute.xlu1 %1756 }
0x10b8   :  { %3387 = vmatmul.mubr.msk.f32.vlgmr.msra.gmra.mrb[14].mxu1 %vm389_vm9, %v1757_v36 }
0x10b9   :  { %3663 = vmatpush3.bf16.msra.mxu1 %v4146_v40  ;;  %3408 = vmatprep.mubr.msk.f32.mxu1 %vm3955_vm8, %v3956_v50  ;;  %v1650_v39 = vpop.permute.xlu0 %1649 }
0x10ba   :  { %3664 = vmatprep.subr.bf16.mxu1 %v3954_v7  ;;  %3376 = vmatmul.mubr.msk.f32.vlgmr.msra.gmra.mrb[14].mxu0 %vm389_vm9, %v1650_v39 }
0x10bb   :  { %3657 = vmatpush3.bf16.msra.mxu0 %v4148_v41  ;;  %3397 = vmatprep.mubr.msk.f32.mxu0 %vm3955_vm8, %v3956_v50 }
0x10bc   :  { %3658 = vmatprep.subr.bf16.mxu0 %v3954_v7 }
0x10bd   :  { %3666 = vmatpush3.bf16.msra.mxu1 %v4168_v48 }
0x10bf   :  { %3660 = vmatpush3.bf16.msra.mxu0 %v4170_v49 }
0x118b   :  { %v1826_v40 = vpop.f32.mrb[14].mxu1 }
0x118c   :  { %v1831_v59 = vrot.slane %v1826_v40, 6  ;;  %v3388_v43 = vpop.f32.mrb[15].mxu1 }
0x118d   :  { %v1719_v45 = vpop.f32.mrb[14].mxu0 }
0x118e   :  { %v1833_v44 = vadd.f32 %v1831_v59, %v4204_v58  ;;  %v1724_v46 = vrot.slane %v1719_v45, 4  ;;  %v3377_v47 = vpop.f32.mrb[15].mxu0 }
0x1190   :  { %3903 = vtanh.f32 %v1833_v44  ;;  %v1726_v41 = vadd.f32 %v1724_v46, %v4202_v56  ;;  %v2990_v53 = vmul.f32 -1.442695, %v1833_v44 }
0x1192   :  { %3905 = vtanh.f32 %v1726_v41  ;;  %v2988_v49 = vmul.f32 -1.442695, %v1726_v41 }
0x1193   :  { %3907 = vpow2.f32 %v2990_v53 }
0x1194   :  { %3909 = vpow2.f32 %v2988_v49 }
0x119a   :  { %v3904_v51 = vpop.eup %3903 }
0x119b   :  { %1846 = vrot.lane.b32.xlu1 %v3904_v51, %s3957_s4 }
0x119c   :  { %v3906_v48 = vpop.eup %3905 }
0x119d   :  { %1739 = vrot.lane.b32.xlu0 %v3906_v48, %s3957_s4  ;;  %v3908_v54 = vpop.eup %3907 }
0x119e   :  { %v3910_v55 = vpop.eup %3909  ;;  %v1837_v60 = vadd.f32 1.0, %v3908_v54 }
0x119f   :  { %v1730_v63 = vadd.f32 1.0, %v3910_v55 }
0x11a0   :  { %3911 = vrcp.f32 %v1837_v60 }
0x11a1   :  { %3913 = vrcp.f32 %v1730_v63 }
0x11aa   :  { %v3912_v0 = vpop.eup %3911 }
0x11ab   :  { %v3914_v5 = vpop.eup %3913  ;;  %v1844_v10 = vmul.f32 %v3912_v0, %v1842_v9 }
0x11ac   :  { %v1737_v15 = vmul.f32 %v3914_v5, %v1735_v11  ;;  %v2996_v11 = vld [vmem:[%s4796_s8 + $0x48] sm:$0xff] }
0x120d   :  { %v1847_v3 = vpop.permute.xlu1 %1846 }
0x120e   :  { %v1849_v4 = vmul.f32 %v3912_v0, %v1847_v3 }
0x120f   :  { %v1740_v6 = vpop.permute.xlu0 %1739 }
0x1210   :  { %1851 = vrot.lane.b32.xlu1 %v1849_v4, %s3958_s7  ;;  %v1742_v8 = vmul.f32 %v3914_v5, %v1740_v6 }
0x1212   :  { %1744 = vrot.lane.b32.xlu0 %v1742_v8, %s3958_s7 }
0x1282   :  { %v1852_v12 = vpop.permute.xlu1 %1851 }
0x1283   :  { %v1854_v31 = vadd.f32 %v1852_v12, %v1844_v10  ;;  %v2995_v10 = vld [vmem:[%s4796_s8 + $0x40] sm:$0xff] }
0x1284   :  { %v1745_v16 = vpop.permute.xlu0 %1744  ;;  %v3018_v12 = vld [vmem:[%s4798_s10 + $0x40] sm:$0xff] }
0x1285   :  { %3915 = vtanh.f32 %v1854_v31  ;;  %v1747_v17 = vadd.f32 %v1745_v16, %v1737_v15  ;;  %v2053_v60 = vrot.slane %v1854_v31, 2  ;;  %v3667_v15 = vpack.c.bf16 %v2996_v11, %v2995_v10  ;;  %v3019_v16 = vld [vmem:[%s4798_s10 + $0x48] sm:$0xff]  ;;  %v2444_v10 = vld [vmem:[%s4798_s10 + $0x18] sm:$0xff] }
0x1287   :  { %3917 = vtanh.f32 %v1747_v17  ;;  %v1949_v4 = vrot.slane %v1747_v17, 6  ;;  %v2997_v17 = vld [vmem:[%s4796_s8 + $0x50] sm:$0xff]  ;;  %3668 = vmatprep.subr.bf16.mxu0 %v3667_v15 }
0x128f   :  { %v3916_v18 = vpop.eup %3915 }
0x1290   :  { %1857 = vrot.lane.b32.xlu1 %v3916_v18, %s3957_s4  ;;  %v2998_v18 = vld [vmem:[%s4796_s8 + $0x58] sm:$0xff] }
0x1291   :  { %v3918_v19 = vpop.eup %3917 }
0x1292   :  { %1750 = vrot.lane.b32.xlu0 %v3918_v19, %s3957_s4  ;;  %v3715_v19 = vpack.c.bf16 %v3019_v16, %v3018_v12  ;;  %v2145_v12 = vld [vmem:[%s4796_s8 + $0x20] sm:$0xff]  ;;  %v2146_v16 = vld [vmem:[%s4796_s8 + $0x28] sm:$0xff] }
0x1294   :  { %3716 = vmatprep.subr.bf16.mxu1 %v3715_v19 }
0x1302   :  { %v1858_v20 = vpop.permute.xlu1 %1857 }
0x1303   :  { %v4472_v22 = vmul.f32 %v3912_v0, %v1858_v20  ;;  %v3671_v20 = vpack.c.bf16 %v2998_v18, %v2997_v17  ;;  %v2445_v17 = vld [vmem:[%s4798_s10 + $0x20] sm:$0xff]  ;;  %v2446_v18 = vld [vmem:[%s4798_s10 + $0x28] sm:$0xff] }
0x1304   :  { %v1751_v23 = vpop.permute.xlu0 %1750 }
0x1305   :  { %v1969_v21 = vrot.slane %v4472_v22, 2  ;;  %v1753_v24 = vmul.f32 %v3914_v5, %v1751_v23  ;;  %v3021_v23 = vld [vmem:[%s4798_s10 + $0x58] sm:$0xff] }
0x1307   :  { %1970 = vrot.lane.b32.xlu1 %v1969_v21, %s3958_s7  ;;  %v1862_v61 = vrot.slane %v1753_v24, 4  ;;  %v4482_v26 = vsel %vm191_vm3, %v2113_v25, %v1753_v24  ;;  %v2999_v25 = vld [vmem:[%s4796_s8 + $0x60] sm:$0xff] }
0x1309   :  { %v4485_v32 = vadd.f32 %v4447_v35, %v1862_v61  ;;  %1863 = vrot.lane.b32.xlu0 %v1862_v61, %s3958_s7  ;;  %v3000_v61 = vld [vmem:[%s4796_s8 + $0x68] sm:$0xff] }
0x1379   :  { %v1971_v33 = vpop.permute.xlu1 %1970 }
0x137a   :  { %3409 = vmatmul.mubr.msk.f32.vlgmr.msra.gmra.mrb[16].mxu1 %vm389_vm9, %v1971_v33  ;;  %v3022_v33 = vld [vmem:[%s4798_s10 + $0x60] sm:$0xff] }
0x137b   :  { %v1864_v34 = vpop.permute.xlu0 %1863  ;;  %3718 = vmatpush3.bf16.msra.mxu1 %v3715_v19  ;;  %v3691_v19 = vpack.c.bf16 %v2146_v16, %v2145_v12  ;;  %v2819_v12 = vld [vmem:[%s4800_s12 + $0x28] sm:$0xff] }
0x137c   :  { %3398 = vmatmul.mubr.msk.f32.vlgmr.msra.gmra.mrb[16].mxu0 %vm389_vm9, %v1864_v34  ;;  %v3675_v34 = vpack.c.bf16 %v3000_v61, %v2999_v25  ;;  %v2448_v25 = vld [vmem:[%s4798_s10 + $0x38] sm:$0xff] }
0x137d   :  { %3670 = vmatpush3.bf16.msra.mxu0 %v3667_v15 }
0x137e   :  { %3672 = vmatprep.subr.bf16.mxu0 %v3671_v20 }
0x1381   :  { %3674 = vmatpush3.bf16.msra.mxu0 %v3671_v20  ;;  %v3739_v20 = vpack.c.bf16 %v2446_v18, %v2445_v17 }
0x1382   :  { %3676 = vmatprep.subr.bf16.mxu0 %v3675_v34 }
0x1385   :  { %3678 = vmatpush3.bf16.msra.mxu0 %v3675_v34  ;;  %v3007_v34 = vld [vmem:[%s4796_s8 + $0x80] sm:$0xff] }
0x144d   :  { %v2040_v42 = vpop.f32.mrb[16].mxu1 }
0x144e   :  { %v2044_v62 = vadd.f32 %v2040_v42, %v4204_v58  ;;  %v3410_v36 = vpop.f32.mrb[17].mxu1  ;;  %v3023_v42 = vld [vmem:[%s4798_s10 + $0x68] sm:$0xff] }
0x144f   :  { %v1933_v39 = vpop.f32.mrb[16].mxu0  ;;  %v3001_v36 = vld [vmem:[%s4796_s8 + $0x70] sm:$0xff] }
0x1450   :  { %3919 = vtanh.f32 %v2044_v62  ;;  %v1938_v40 = vrot.slane %v1933_v39, 2  ;;  %v3399_v59 = vpop.f32.mrb[17].mxu0  ;;  %v2994_v45 = vmul.f32 -1.442695, %v2044_v62  ;;  %v3723_v62 = vpack.c.bf16 %v3023_v42, %v3022_v33  ;;  %v3002_v39 = vld [vmem:[%s4796_s8 + $0x78] sm:$0xff]  ;;  %v3008_v42 = vld [vmem:[%s4796_s8 + $0x88] sm:$0xff] }
0x1451   :  { %v3679_v59 = vpack.c.bf16 %v3002_v39, %v3001_v36  ;;  %v3031_v36 = vld [vmem:[%s4798_s10 + $0x88] sm:$0xff]  ;;  %v3699_v39 = vpack.c.bf16 %v3008_v42, %v3007_v34 }
0x1452   :  { %v1940_v43 = vadd.f32 %v1938_v40, %v4202_v56  ;;  %v3024_v40 = vld [vmem:[%s4798_s10 + $0x70] sm:$0xff] }
0x1453   :  { %3680 = vmatprep.subr.bf16.mxu0 %v3679_v59 }
0x1454   :  { %3921 = vtanh.f32 %v1940_v43  ;;  %v2992_v46 = vmul.f32 -1.442695, %v1940_v43  ;;  %v3025_v43 = vld [vmem:[%s4798_s10 + $0x78] sm:$0xff]  ;;  %3682 = vmatpush3.bf16.msra.mxu0 %v3679_v59  ;;  %v3009_v59 = vld [vmem:[%s4796_s8 + $0x90] sm:$0xff] }
0x1455   :  { %3923 = vpow2.f32 %v2994_v45  ;;  %v2141_v45 = vld [vmem:[%s4796_s8] sm:$0xff] }
0x1456   :  { %3925 = vpow2.f32 %v2992_v46  ;;  %v2142_v46 = vld [vmem:[%s4796_s8 + $0x8] sm:$0xff] }
0x145a   :  { %v3920_v35 = vpop.eup %3919 }
0x145b   :  { %2057 = vrot.lane.b32.xlu0 %v3920_v35, %s3957_s4  ;;  %v3727_v35 = vpack.c.bf16 %v3025_v43, %v3024_v40 }
0x145e   :  { %v3922_v44 = vpop.eup %3921 }
0x145f   :  { %1953 = vrot.lane.b32.xlu1 %v3922_v44, %s3957_s4  ;;  %v3924_v47 = vpop.eup %3923 }
0x1460   :  { %v2048_v58 = vadd.f32 1.0, %v3924_v47  ;;  %v3926_v41 = vpop.eup %3925  ;;  %v2441_v47 = vld [vmem:[%s4798_s10] sm:$0xff] }
0x1461   :  { %v1944_v51 = vadd.f32 1.0, %v3926_v41  ;;  %v3683_v41 = vpack.c.bf16 %v2142_v46, %v2141_v45  ;;  %v3033_v45 = vld [vmem:[%s4798_s10 + $0x98] sm:$0xff] }
0x1462   :  { %3927 = vrcp.f32 %v2048_v58 }
0x1463   :  { %3929 = vrcp.f32 %v1944_v51  ;;  %v2442_v51 = vld [vmem:[%s4798_s10 + $0x8] sm:$0xff]  ;;  %3684 = vmatprep.subr.bf16.mxu0 %v3683_v41 }
0x146c   :  { %v4494_v48 = vpop.eup %3927 }
0x146d   :  { %v4498_v49 = vpop.eup %3929  ;;  %v2055_v63 = vmul.f32 %v4494_v48, %v2053_v60 }
0x146e   :  { %v1951_v5 = vmul.f32 %v4498_v49, %v1949_v4 }
0x14cd   :  { %v2058_v56 = vpop.permute.xlu0 %2057 }
0x14ce   :  { %v2060_v53 = vmul.f32 %v4494_v48, %v2058_v56  ;;  %v3731_v56 = vpack.c.bf16 %v2442_v51, %v2441_v47  ;;  %v3012_v51 = vld [vmem:[%s4796_s8 + $0xa8] sm:$0xff] }
0x14d0   :  { %2062 = vrot.lane.b32.xlu0 %v2060_v53, %s3958_s7 }
0x14d1   :  { %v1954_v54 = vpop.permute.xlu1 %1953 }
0x14d2   :  { %v1956_v55 = vmul.f32 %v4498_v49, %v1954_v54 }
0x14d4   :  { %1958 = vrot.lane.b32.xlu1 %v1956_v55, %s3958_s7 }
0x1542   :  { %v2063_v0 = vpop.permute.xlu0 %2062 }
0x1543   :  { %v2065_v3 = vadd.f32 %v2063_v0, %v2055_v63  ;;  %v2119_v0 = vsel %vm187_vm1, %v4354_v52, %v4306_v1 }
0x1544   :  { %v2120_v4 = vsel %vm191_vm3, %v2119_v0, %v4264_v13  ;;  %v2143_v13 = vld [vmem:[%s4796_s8 + $0x10] sm:$0xff] }
0x1545   :  { %3931 = vtanh.f32 %v2065_v3  ;;  %v3036_v0 = vld [vmem:[%s4798_s10 + $0xb0] sm:$0xff] }
0x1546   :  { %v1959_v6 = vpop.permute.xlu1 %1958 }
0x1547   :  { %v1961_v8 = vadd.f32 %v1959_v6, %v1951_v5 }
0x1549   :  { %3933 = vtanh.f32 %v1961_v8 }
0x154f   :  { %v3932_v9 = vpop.eup %3931 }
0x1550   :  { %2068 = vrot.lane.b32.xlu0 %v3932_v9, %s3957_s4  ;;  %v2443_v9 = vld [vmem:[%s4798_s10 + $0x10] sm:$0xff] }
0x1551   :  { %v3735_v15 = vpack.c.bf16 %v2444_v10, %v2443_v9  ;;  %v2817_v9 = vld [vmem:[%s4800_s12 + $0x18] sm:$0xff] }
0x1553   :  { %v3934_v31 = vpop.eup %3933 }
0x1554   :  { %2124 = vrot.lane.b32.xlu0 %v4360_v57, %s3958_s7  ;;  %1964 = vrot.lane.b32.xlu1 %v3934_v31, %s3957_s4  ;;  %v3020_v57 = vld [vmem:[%s4798_s10 + $0x50] sm:$0xff] }
0x1555   :  { %v3719_v24 = vpack.c.bf16 %v3021_v23, %v3020_v57  ;;  %v2147_v57 = vld [vmem:[%s4796_s8 + $0x30] sm:$0xff]  ;;  %v2148_v23 = vld [vmem:[%s4796_s8 + $0x38] sm:$0xff] }
0x1556   :  { %v3695_v61 = vpack.c.bf16 %v2148_v23, %v2147_v57 }
0x1557   :  { %3720 = vmatprep.subr.bf16.mxu1 %v3719_v24 }
0x1558   :  { %3722 = vmatpush3.bf16.msra.mxu1 %v3719_v24  ;;  %v2447_v24 = vld [vmem:[%s4798_s10 + $0x30] sm:$0xff] }
0x1559   :  { %3724 = vmatprep.subr.bf16.mxu1 %v3723_v62  ;;  %v3743_v33 = vpack.c.bf16 %v2448_v25, %v2447_v24 }
0x155c   :  { %3726 = vmatpush3.bf16.msra.mxu1 %v3723_v62  ;;  %v3030_v62 = vld [vmem:[%s4798_s10 + $0x80] sm:$0xff] }
0x155d   :  { %3728 = vmatprep.subr.bf16.mxu1 %v3727_v35  ;;  %v3747_v40 = vpack.c.bf16 %v3031_v36, %v3030_v62 }
0x1560   :  { %3730 = vmatpush3.bf16.msra.mxu1 %v3727_v35  ;;  %v3010_v35 = vld [vmem:[%s4796_s8 + $0x98] sm:$0xff] }
0x1561   :  { %3732 = vmatprep.subr.bf16.mxu1 %v3731_v56  ;;  %v3703_v47 = vpack.c.bf16 %v3010_v35, %v3009_v59  ;;  %v2821_v59 = vld [vmem:[%s4800_s12 + $0x38] sm:$0xff] }
0x15c2   :  { %v2069_v44 = vpop.permute.xlu0 %2068 }
0x15c3   :  { %v2071_v58 = vmul.f32 %v4494_v48, %v2069_v44  ;;  %v3032_v44 = vld [vmem:[%s4798_s10 + $0x90] sm:$0xff] }
0x15c5   :  { %v2075_v53 = vadd.f32 %v2071_v58, %v1969_v21  ;;  %v2116_v54 = vsel %vm187_vm1, %v2071_v58, %v4472_v22  ;;  %v3751_v58 = vpack.c.bf16 %v3033_v45, %v3032_v44 }
0x15c6   :  { %v2117_v55 = vsel %vm191_vm3, %v2116_v54, %v4436_v27  ;;  %v1965_v60 = vpop.permute.xlu1 %1964  ;;  %v3035_v54 = vld [vmem:[%s4798_s10 + $0xa8] sm:$0xff] }
0x15c7   :  { %v2079_v48 = vadd.f32 %v2075_v53, %v1755_v30  ;;  %v2118_v63 = vsel %vm195_vm5, %v2117_v55, %v4396_v37  ;;  %v1967_v21 = vmul.f32 %v4498_v49, %v1965_v60  ;;  %v2121_v37 = vsel %vm195_vm5, %v2120_v4, %v4224_v28  ;;  %v3034_v53 = vld [vmem:[%s4798_s10 + $0xa0] sm:$0xff]  ;;  %v3013_v60 = vld [vmem:[%s4796_s8 + $0xb0] sm:$0xff] }
0x15c8   :  { %2132 = vrot.lane.b32.xlu0 %v2118_v63, %s3957_s4  ;;  %v3014_v63 = vld [vmem:[%s4796_s8 + $0xb8] sm:$0xff] }
0x15c9   :  { %v2083_v22 = vadd.f32 %v2079_v48, %v1541_v38  ;;  %v2095_v3 = vrot.slane %v1967_v21, 6  ;;  %v2115_v27 = vsel %vm195_vm5, %v4482_v26, %v1967_v21  ;;  %v2125_v26 = vpop.permute.xlu0 %2124  ;;  %v3755_v48 = vpack.c.bf16 %v3035_v54, %v3034_v53  ;;  %v3037_v21 = vld [vmem:[%s4798_s10 + $0xb8] sm:$0xff] }
0x15ca   :  { %2126 = vrot.lane.b32.xlu1 %v2115_v27, %s3958_s7  ;;  %v3040_v27 = vld [vmem:[%s4798_s10 + $0xc0] sm:$0xff] }
0x15cb   :  { %v2085_v30 = vadd.f32 %v2083_v22, %v4354_v52  ;;  %v2097_v5 = vadd.f32 %v2095_v3, %v4485_v32  ;;  %v3711_v22 = vpack.c.bf16 %v3014_v63, %v3013_v60  ;;  %v3759_v3 = vpack.c.bf16 %v3037_v21, %v3036_v0 }
0x15cd   :  { %v2089_v49 = vadd.f32 %v2085_v30, %v1121_v2  ;;  %2101 = vrot.lane.b32.xlu0 %v2097_v5, %s3958_s7  ;;  %v3041_v30 = vld [vmem:[%s4798_s10 + $0xc8] sm:$0xff]  ;;  %v3042_v5 = vld [vmem:[%s4798_s10 + $0xd0] sm:$0xff] }
0x15ce   :  { %2134 = vrot.lane.b32.xlu1 %v2121_v37, %s3957_s4  ;;  %v3763_v4 = vpack.c.bf16 %v3041_v30, %v3040_v27  ;;  %v3051_v27 = vld [vmem:[#allocation4] ss:$0 sm:$0xff] }
0x15cf   :  { %v2093_v52 = vadd.f32 %v2089_v49, %v907_v14  ;;  %v3043_v49 = vld [vmem:[%s4798_s10 + $0xd8] sm:$0xff] }
0x15d1   :  { %v2099_v38 = vadd.f32 %v2093_v52, %v693_v29  ;;  %v2144_v29 = vld [vmem:[%s4796_s8 + $0x18] sm:$0xff] }
0x15d2   :  { %v3687_v31 = vpack.c.bf16 %v2144_v29, %v2143_v13 }
0x15d3   :  { %2105 = vrot.lane.b32.xlu1 %v2099_v38, %s3957_s4  ;;  %v3767_v38 = vpack.c.bf16 %v3043_v49, %v3042_v5 }
0x163a   :  { %v2133_v32 = vpop.permute.xlu0 %2132 }
0x163b   :  { %v4605_v1 = vsel %vm389_vm9, %v2125_v26, %v2133_v32  ;;  %v3044_v26 = vld [vmem:[%s4798_s10 + $0xe0] sm:$0xff]  ;;  %v3045_v32 = vld [vmem:[%s4798_s10 + $0xe8] sm:$0xff] }
0x163c   :  { %v2127_v6 = vpop.permute.xlu1 %2126  ;;  %v2160_v14 = vrot.slane %v4605_v1, 2  ;;  %v2331_v46 = vrot.slane %v4605_v1, 4  ;;  %v2703_v52 = vrot.slane %v4605_v1, 6 }
0x163f   :  { %v2102_v60 = vpop.permute.xlu0 %2101 }
0x1640   :  { %v2135_v2 = vpop.permute.xlu1 %2134 }
0x1641   :  { %v4608_v8 = vsel %vm389_vm9, %v2127_v6, %v2135_v2  ;;  %v3046_v2 = vld [vmem:[%s4798_s10 + $0xf0] sm:$0xff] }
0x1642   :  { %v2161_v28 = vrot.slane %v4608_v8, 2  ;;  %v2332_v43 = vrot.slane %v4608_v8, 4  ;;  %v2704_v37 = vrot.slane %v4608_v8, 6 }
0x1644   :  { %v2162_v11 = vsel %vm195_vm5, %v2160_v14, %v2161_v28  ;;  %v2705_v6 = vsel %vm187_vm1, %v2703_v52, %v2704_v37  ;;  %v2815_v14 = vld [vmem:[%s4800_s12 + $0x8] sm:$0xff] }
0x1645   :  { %3427 = vmatprep.mubr.msk.f32.mxu0 %vm2163_vm10, %v2162_v11  ;;  %3484 = vmatprep.mubr.msk.f32.mxu1 %vm2163_vm10, %v2162_v11  ;;  %v2818_v11 = vld [vmem:[%s4800_s12 + $0x20] sm:$0xff] }
0x1646   :  { %3428 = vmatmul.mubr.msk.f32.vlgmr.msra.gmra.mrb[18].mxu0 %vm2163_vm10, %v2161_v28  ;;  %3485 = vmatmul.mubr.msk.f32.vlgmr.msra.gmra.mrb[18].mxu1 %vm2163_vm10, %v2161_v28  ;;  %v2816_v28 = vld [vmem:[%s4800_s12 + $0x10] sm:$0xff] }
0x1647   :  { %3686 = vmatpush3.bf16.msra.mxu0 %v3683_v41  ;;  %3734 = vmatpush3.bf16.msra.mxu1 %v3731_v56  ;;  %v3011_v41 = vld [vmem:[%s4796_s8 + $0xa0] sm:$0xff]  ;;  %v2333_v56 = vsel %vm191_vm3, %v2331_v46, %v2332_v43  ;;  %v3783_v10 = vpack.c.bf16 %v2817_v9, %v2816_v28 }
0x1648   :  { %3446 = vmatprep.mubr.msk.f32.mxu0 %vm2163_vm10, %v4605_v1  ;;  %3503 = vmatprep.mubr.msk.f32.mxu1 %vm2163_vm10, %v4605_v1  ;;  %v3707_v55 = vpack.c.bf16 %v3012_v51, %v3011_v41  ;;  %v3771_v1 = vpack.c.bf16 %v3045_v32, %v3044_v26 }
0x1649   :  { %3688 = vmatprep.subr.bf16.mxu0 %v3687_v31  ;;  %3736 = vmatprep.subr.bf16.mxu1 %v3735_v15 }
0x164b   :  { %3690 = vmatpush3.bf16.msra.mxu0 %v3687_v31  ;;  %3738 = vmatpush3.bf16.msra.mxu1 %v3735_v15  ;;  %v3786_v31 = vpack.c.bf16 %v2819_v12, %v2818_v11  ;;  %v3017_v15 = vld [vmem:[%s4797_s9] ss:$0 sm:$0xff] }
0x164c   :  { %3692 = vmatprep.subr.bf16.mxu0 %v3691_v19  ;;  %3740 = vmatprep.subr.bf16.mxu1 %v3739_v20 }
0x164f   :  { %3694 = vmatpush3.bf16.msra.mxu0 %v3691_v19  ;;  %3742 = vmatpush3.bf16.msra.mxu1 %v3739_v20 }
0x1650   :  { %3696 = vmatprep.subr.bf16.mxu0 %v3695_v61  ;;  %3744 = vmatprep.subr.bf16.mxu1 %v3743_v33 }
0x1653   :  { %3698 = vmatpush3.bf16.msra.mxu0 %v3695_v61  ;;  %3746 = vmatpush3.bf16.msra.mxu1 %v3743_v33 }
0x1654   :  { %3700 = vmatprep.subr.bf16.mxu0 %v3699_v39  ;;  %3748 = vmatprep.subr.bf16.mxu1 %v3747_v40 }
0x1656   :  { %3447 = vmatmul.mubr.msk.f32.vlgmr.msra.gmra.mrb[18].mxu0 %vm2163_vm10, %v4608_v8  ;;  %3504 = vmatmul.mubr.msk.f32.vlgmr.msra.gmra.mrb[18].mxu1 %vm2163_vm10, %v4608_v8  ;;  %v3047_v8 = vld [vmem:[%s4798_s10 + $0xf8] sm:$0xff] }
0x1657   :  { %3702 = vmatpush3.bf16.msra.mxu0 %v3699_v39  ;;  %3465 = vmatprep.mubr.msk.f32.mxu0 %vm2163_vm10, %v2333_v56  ;;  %v3775_v13 = vpack.c.bf16 %v3047_v8, %v3046_v2 }
0x1658   :  { %3750 = vmatpush3.bf16.msra.mxu1 %v3747_v40  ;;  %3522 = vmatprep.mubr.msk.f32.mxu1 %vm2163_vm10, %v2333_v56  ;;  %v2820_v40 = vld [vmem:[%s4800_s12 + $0x30] sm:$0xff] }
0x1659   :  { %3704 = vmatprep.subr.bf16.mxu0 %v3703_v47  ;;  %3752 = vmatprep.subr.bf16.mxu1 %v3751_v58  ;;  %v3789_v35 = vpack.c.bf16 %v2821_v59, %v2820_v40 }
0x165b   :  { %3706 = vmatpush3.bf16.msra.mxu0 %v3703_v47 }
0x165c   :  { %3754 = vmatpush3.bf16.msra.mxu1 %v3751_v58  ;;  %3708 = vmatprep.subr.bf16.mxu0 %v3707_v55 }
0x165d   :  { %3756 = vmatprep.subr.bf16.mxu1 %v3755_v48 }
0x165f   :  { %3710 = vmatpush3.bf16.msra.mxu0 %v3707_v55 }
0x1660   :  { %3758 = vmatpush3.bf16.msra.mxu1 %v3755_v48  ;;  %3712 = vmatprep.subr.bf16.mxu0 %v3711_v22  ;;  %v2106_v48 = vpop.permute.xlu1 %2105 }
0x1661   :  { %3760 = vmatprep.subr.bf16.mxu1 %v3759_v3  ;;  %v2108_v63 = vsel %vm389_vm9, %v2102_v60, %v2106_v48 }
0x1662   :  { %v2109_v0 = vmul.f32 0.125, %v2108_v63 }
0x1663   :  { %3714 = vmatpush3.bf16.msra.mxu0 %v3711_v22 }
0x1664   :  { %3762 = vmatpush3.bf16.msra.mxu1 %v3759_v3  ;;  %3779 = vmatprep.subr.bf16.mxu0 %v3954_v7 }
0x1665   :  { %3764 = vmatprep.subr.bf16.mxu1 %v3763_v4 }
0x1666   :  { %3466 = vmatmul.mubr.msk.f32.vlgmr.msra.gmra.mrb[18].mxu0 %vm2163_vm10, %v2332_v43 }
0x1667   :  { %3523 = vmatmul.mubr.msk.f32.vlgmr.msra.gmra.mrb[18].mxu1 %vm2163_vm10, %v2332_v43  ;;  %3560 = vmatprep.mubr.msk.f32.mxu0 %vm3955_vm8, %v3956_v50  ;;  %v2814_v50 = vld [vmem:[%s4800_s12] sm:$0xff] }
0x1668   :  { %3766 = vmatpush3.bf16.msra.mxu1 %v3763_v4  ;;  %3541 = vmatprep.mubr.msk.f32.mxu1 %vm2163_vm10, %v2705_v6  ;;  %v3780_v29 = vpack.c.bf16 %v2815_v14, %v2814_v50 }
0x1669   :  { %3768 = vmatprep.subr.bf16.mxu1 %v3767_v38 }
0x166a   :  { %3781 = vmatpush3.bf16.msra.mxu0 %v3780_v29 }
0x166b   :  { %3782 = vmatprep.subr.bf16.mxu0 %v3954_v7 }
0x166c   :  { %3770 = vmatpush3.bf16.msra.mxu1 %v3767_v38 }
0x166d   :  { %3772 = vmatprep.subr.bf16.mxu1 %v3771_v1 }
0x166e   :  { %3784 = vmatpush3.bf16.msra.mxu0 %v3783_v10 }
0x166f   :  { %3785 = vmatprep.subr.bf16.mxu0 %v3954_v7 }
0x1670   :  { %3774 = vmatpush3.bf16.msra.mxu1 %v3771_v1 }
0x1671   :  { %3776 = vmatprep.subr.bf16.mxu1 %v3775_v13 }
0x1672   :  { %3787 = vmatpush3.bf16.msra.mxu0 %v3786_v31 }
0x1673   :  { %3788 = vmatprep.subr.bf16.mxu0 %v3954_v7  ;;  %v3050_v7 = vld [vmem:[%s4805_s3] ss:$0 sm:$0xff] }
0x1674   :  { %3778 = vmatpush3.bf16.msra.mxu1 %v3775_v13 }
0x1676   :  { %3790 = vmatpush3.bf16.msra.mxu0 %v3789_v35 }
0x1677   :  { %3542 = vmatmul.mubr.msk.f32.vlgmr.msra.gmra.mrb[18].mxu1 %vm2163_vm10, %v2704_v37 }
0x1739   :  { %v3467_v16 = vpop.f32.mrb[18].mxu0 }
0x173a   :  { %v2404_v17 = vpop.f32.mrb[19].mxu0  ;;  %v2422_v20 = vadd.f32 %v3467_v16, %v3017_v15 }
0x173b   :  { %v2421_v18 = vadd.f32 %v3017_v15, %v2404_v17 }
0x173c   :  { %v2424_v25 = vmax.f32 %v2422_v20, 0.0 }
0x173d   :  { %v2423_v19 = vmax.f32 %v2421_v18, 0.0 }
0x173e   :  { %v2437_v42 = vrot.slane %v2424_v25, 2 }
0x173f   :  { %v2426_v57 = vrot.slane %v2423_v19, 2  ;;  %v2429_v24 = vrot.slane %v2423_v19, 4  ;;  %v2432_v33 = vrot.slane %v2423_v19, 6 }
0x1741   :  { %v2428_v23 = vmax.f32 %v2423_v19, %v2426_v57 }
0x1743   :  { %v2431_v61 = vmax.f32 %v2428_v23, %v2429_v24 }
0x1745   :  { %v2434_v34 = vmax.f32 %v2431_v61, %v2432_v33 }
0x1747   :  { %v2435_v62 = vmax.f32 %v2434_v34, %v2424_v25 }
0x1749   :  { %v2439_v36 = vmax.f32 %v2435_v62, %v2437_v42 }
0x174a   :  { %v3543_v39 = vpop.f32.mrb[18].mxu1 }
0x174b   :  { %v2776_v43 = vpop.f32.mrb[19].mxu1  ;;  %v2794_v47 = vadd.f32 %v3543_v39, %v3050_v7 }
0x174c   :  { %v2793_v44 = vadd.f32 %v3050_v7, %v2776_v43 }
0x174d   :  { %v2796_v53 = vmax.f32 %v2794_v47, 0.0 }
0x174e   :  { %v2795_v45 = vmax.f32 %v2793_v44, 0.0 }
0x1750   :  { %v2798_v46 = vrot.slane %v2795_v45, 2  ;;  %v2801_v41 = vrot.slane %v2795_v45, 4  ;;  %v2804_v56 = vrot.slane %v2795_v45, 6 }
0x1752   :  { %v2800_v58 = vmax.f32 %v2795_v45, %v2798_v46 }
0x1754   :  { %v2803_v51 = vmax.f32 %v2800_v58, %v2801_v41 }
0x1756   :  { %v2806_v54 = vmax.f32 %v2803_v51, %v2804_v56 }
0x1758   :  { %v2807_v55 = vmax.f32 %v2806_v54, %v2796_v53 }
0x175a   :  { %2809 = vrot.lane.b32.xlu0 %v2807_v55, %s3958_s7 }
0x17cc   :  { %v2810_v21 = vpop.permute.xlu0 %2809 }
0x17cd   :  { %v2812_v22 = vsel %vm389_vm9, %v2439_v36, %v2810_v21 }
0x17ce   :  { %v2813_v3 = vadd.f32 %v2812_v22, %v2109_v0 }
0x17d0   :  { %3561 = vmatmul.mubr.msk.f32.vlgmr.msra.gmra.mrb[20].mxu0 %vm2163_vm10, %v2813_v3 }
0x18a3   :  { %v2898_v30 = vpop.f32.mrb[20].mxu0 }
0x18a4   :  { %v2899_v4 = vadd.f32 %v3051_v27, %v2898_v30  ;;  %v3562_v5 = vpop.f32.mrb[21].mxu0 }
0x18a6   :  { %v3053_v49 = vmul.f32 -1.442695, %v2899_v4 }
0x18a8   :  { %3935 = vpow2.f32 %v3053_v49 }
0x18b2   :  { %v3936_v37 = vpop.eup %3935 }
0x18b3   :  { %v2905_v52 = vadd.f32 1.0, %v3936_v37 }
0x18b5   :  { %3937 = vrcp.f32 %v2905_v52 }
0x18bf   :  { %v3938_v38 = vpop.eup %3937 }
0x18c0   :  { %2909 = vst.msk [vmem:[%s4806_s25] sm:$0x3] %vm2908_vm11, %v3938_v38 }

</bundles_post_ra>
